<compile_context>
chip_gen: v7x
topology: tpu7x:2x2x1
jax: 0.10.0
libtpu: 0.0.40
codegen_flags: <defaults>
</compile_context>

<pallas_src>
import jax
import jax.numpy as jnp
from jax.experimental import pallas as pl
from jax.experimental.pallas import tpu as pltpu

K = 11      # conv kernel size
PAD = 5     # "same" padding on each side
C_IN = 46
C_MID = 10  # conv1..conv4 out channels; conv5 is padded 9 -> 10
C_OUT = 9


def cnn_kernel(x_ref, w1_ref, wrest_ref, b_ref, out_ref):
    # x_ref:    (NB, C_IN, L)        block of NB batch samples
    # w1_ref:   (C_MID, K*C_IN)      layer-1 im2col weight
    # wrest_ref:(4, C_MID, K*C_MID)  layers 2..5 (layer 5 zero-padded to 10 rows)
    # b_ref:    (5, C_MID, 1)        biases (layer-5 padded with a zero)
    # out_ref:  (NB, C_OUT, L)
    nb = x_ref.shape[0]
    L = x_ref.shape[2]
    cdt = w1_ref.dtype                     # compute dtype (f32 or bf16)

    w1 = w1_ref[...]
    wrest = wrest_ref[...]
    bias = b_ref[...]                      # f32

    def conv_relu(h, w, b):
        # h: (Cin, L) with L on lanes; w: (Cout, K*Cin); b: (Cout, 1)
        cin = h.shape[0]
        z = jnp.zeros((cin, PAD), h.dtype)
        hp = jnp.concatenate([z, h, z], axis=1)                 # (Cin, L+10)
        # im2col: row (k*Cin + c), col l  ==  x_pad[c, l + k]
        cols = jnp.concatenate([hp[:, k:k + L] for k in range(K)], axis=0)
        acc = jnp.dot(w, cols, preferred_element_type=jnp.float32)  # (Cout, L)
        return jnp.maximum(acc + b, 0.0)

    for n in range(nb):                    # static unroll over the batch block
        h = conv_relu(x_ref[n].astype(cdt), w1, bias[0]).astype(cdt)
        h = conv_relu(h, wrest[0], bias[1]).astype(cdt)
        h = conv_relu(h, wrest[1], bias[2]).astype(cdt)
        h = conv_relu(h, wrest[2], bias[3]).astype(cdt)
        h = conv_relu(h, wrest[3], bias[4])                     # (10, L) f32
        out_ref[n] = h[:C_OUT, :].astype(out_ref.dtype)         # drop pad row


def _im2col_weight(w):
    # PyTorch weight (Cout, Cin, K) -> (Cout, K*Cin) with column = k*Cin + c.
    cout, cin, k = w.shape
    return jnp.transpose(w, (0, 2, 1)).reshape(cout, k * cin)


def cnn_forward_pallas(x_ncl, params, *, batch_block=8,
                       compute_dtype=jnp.float32):
    """x_ncl: (N, 46, L) float32. params: list of (w (Cout,Cin,K), b (Cout,)).
    Returns (N, 9, L), matching the PyTorch module."""
    N, C, L = x_ncl.shape
    assert C == C_IN

    # ---- repack weights/biases into 3 stacked, VMEM-resident arrays --------
    (w1, b1), (w2, b2), (w3, b3), (w4, b4), (w5, b5) = params
    w1_i2c = _im2col_weight(w1.astype(jnp.float32))             # (10, 506)
    w5_i2c = _im2col_weight(w5.astype(jnp.float32))             # (9, 110)
    w5_i2c = jnp.pad(w5_i2c, ((0, C_MID - C_OUT), (0, 0)))      # -> (10, 110)
    wrest = jnp.stack([_im2col_weight(w2.astype(jnp.float32)),
                       _im2col_weight(w3.astype(jnp.float32)),
                       _im2col_weight(w4.astype(jnp.float32)),
                       w5_i2c], axis=0)                         # (4, 10, 110)
    b5_pad = jnp.pad(b5.astype(jnp.float32), (0, C_MID - C_OUT))
    b_all = jnp.stack([b1, b2, b3, b4, b5_pad], axis=0).astype(jnp.float32)
    b_all = b_all.reshape(5, C_MID, 1)                          # (5, 10, 1)

    w1_i2c = w1_i2c.astype(compute_dtype)
    wrest = wrest.astype(compute_dtype)
    x = x_ncl.astype(compute_dtype)

    # ---- block the batch axis ----------------------------------------------
    nb = min(N, batch_block)
    n_blocks = pl.cdiv(N, nb)
    n_pad = n_blocks * nb
    if n_pad > N:
        x = jnp.pad(x, ((0, n_pad - N), (0, 0), (0, 0)))

    out = pl.pallas_call(
        cnn_kernel,
        out_shape=jax.ShapeDtypeStruct((n_pad, C_OUT, L), jnp.float32),
        grid_spec=pltpu.PrefetchScalarGridSpec(
            num_scalar_prefetch=0,
            grid=(n_blocks,),
            in_specs=[
                pl.BlockSpec((nb, C_IN, L), lambda i: (i, 0, 0)),
                pl.BlockSpec((C_MID, K * C_IN), lambda i: (0, 0)),
                pl.BlockSpec((4, C_MID, K * C_MID), lambda i: (0, 0, 0)),
                pl.BlockSpec((5, C_MID, 1), lambda i: (0, 0, 0)),
            ],
            out_specs=pl.BlockSpec((nb, C_OUT, L), lambda i: (i, 0, 0)),
        ),
        compiler_params=pltpu.CompilerParams(
            dimension_semantics=("parallel",)),
    )(x, w1_i2c, wrest, b_all)

    return out[:N]


def cnn_forward_reference(x_ncl, params):
    """Pure-JAX reference matching torch semantics (NCL conv, same padding)."""
    h = x_ncl.astype(jnp.float32)
    for (w, b) in params:
        h = jax.lax.conv_general_dilated(
            h, w.astype(jnp.float32),
            window_strides=(1,), padding=[(PAD, PAD)],
            dimension_numbers=("NCH", "OIH", "NCH"))
        h = jnp.maximum(h + b[None, :, None], 0.0)
    return h


def make_params(key):
    """Deterministic synthetic parameters with the module's shapes."""
    shapes = [
        (C_MID, C_IN, K),   # conv1
        (C_MID, C_MID, K),  # conv2
        (C_MID, C_MID, K),  # conv3
        (C_MID, C_MID, K),  # conv4
        (C_OUT, C_MID, K),  # conv5
    ]
    params = []
    for shp in shapes:
        key, kw, kb = jax.random.split(key, 3)
        fan_in = shp[1] * shp[2]
        scale = 1.0 / jnp.sqrt(fan_in)
        w = jax.random.uniform(kw, shp, jnp.float32, -scale, scale)
        b = jax.random.uniform(kb, (shp[0],), jnp.float32, -scale, scale)
        params.append((w, b))
    return params


if __name__ == "__main__":
    key = jax.random.PRNGKey(0)
    key, kx = jax.random.split(key)
    params = make_params(key)

    # Case 1: small canonical shape.
    N, L = 2, 16
    x = jax.random.normal(kx, (N, C_IN, L), jnp.float32)
    out = jax.block_until_ready(cnn_forward_pallas(x, params))
    ref = jax.block_until_ready(cnn_forward_reference(x, params))
    assert out.shape == (N, C_OUT, L), out.shape
    assert jnp.allclose(out, ref, atol=1e-3, rtol=1e-3), (
        float(jnp.max(jnp.abs(out - ref))))

    # Case 2: odd length / odd batch to exercise generality of the tiling.
    key, kx2 = jax.random.split(key)
    N2, L2 = 5, 33
    x2 = jax.random.normal(kx2, (N2, C_IN, L2), jnp.float32)
    out2 = jax.block_until_ready(cnn_forward_pallas(x2, params))
    ref2 = jax.block_until_ready(cnn_forward_reference(x2, params))
    assert out2.shape == (N2, C_OUT, L2), out2.shape
    assert jnp.allclose(out2, ref2, atol=1e-3, rtol=1e-3), (
        float(jnp.max(jnp.abs(out2 - ref2))))

    print("KERNEL_OK")
</pallas_src>

<mosaic_0001>
module attributes {stable_mosaic.version = 11 : i64} {
  func.func @cnn_kernel(%arg0: i32, %arg1: memref<2x46x16xf32, #tpu.memory_space<vmem>>, %arg2: memref<10x506xf32, #tpu.memory_space<vmem>>, %arg3: memref<4x10x110xf32, #tpu.memory_space<vmem>>, %arg4: memref<5x10x1xf32, #tpu.memory_space<vmem>>, %arg5: memref<2x9x16xf32, #tpu.memory_space<vmem>>) attributes {dimension_semantics = [#tpu.dimension_semantics<parallel>], iteration_bounds = array<i64: 1>, scalar_prefetch = 0 : i64, scratch_operands = 0 : i64, tpu.core_type = #tpu.core_type<tc>, window_params = [{transform_indices = @transform_0, window_bounds = array<i64: 2, 46, 16>}, {pipeline_mode = #tpu.pipeline_mode<synchronous>, transform_indices = @transform_1, window_bounds = array<i64: 10, 506>}, {pipeline_mode = #tpu.pipeline_mode<synchronous>, transform_indices = @transform_2, window_bounds = array<i64: 4, 10, 110>}, {pipeline_mode = #tpu.pipeline_mode<synchronous>, transform_indices = @transform_3, window_bounds = array<i64: 5, 10, 1>}, {transform_indices = @transform_4, window_bounds = array<i64: 2, 9, 16>}]} {
    %c0 = arith.constant 0 : index
    %c0_0 = arith.constant 0 : index
    %0 = vector.load %arg2[%c0, %c0_0] : memref<10x506xf32, #tpu.memory_space<vmem>>, vector<10x506xf32>
    %c0_1 = arith.constant 0 : index
    %c0_2 = arith.constant 0 : index
    %c0_3 = arith.constant 0 : index
    %1 = vector.load %arg3[%c0_1, %c0_2, %c0_3] : memref<4x10x110xf32, #tpu.memory_space<vmem>>, vector<4x10x110xf32>
    %c0_4 = arith.constant 0 : index
    %c0_5 = arith.constant 0 : index
    %c0_6 = arith.constant 0 : index
    %2 = vector.load %arg4[%c0_4, %c0_5, %c0_6] : memref<5x10x1xf32, #tpu.memory_space<vmem>>, vector<5x10x1xf32>
    %c0_7 = arith.constant 0 : index
    %c0_8 = arith.constant 0 : index
    %c0_9 = arith.constant 0 : index
    %3 = vector.load %arg1[%c0_7, %c0_8, %c0_9] : memref<2x46x16xf32, #tpu.memory_space<vmem>>, vector<1x46x16xf32>
    %4 = vector.shape_cast %3 : vector<1x46x16xf32> to vector<46x16xf32>
    %5 = vector.extract_strided_slice %2 {offsets = [0, 0, 0], sizes = [1, 10, 1], strides = [1, 1, 1]} : vector<5x10x1xf32> to vector<1x10x1xf32>
    %6 = vector.shape_cast %5 : vector<1x10x1xf32> to vector<10x1xf32>
    %cst = arith.constant 0.000000e+00 : f32
    %7 = vector.broadcast %cst : f32 to vector<46x5xf32>
    %8 = tpu.concatenate %7, %4, %7 in 1 : vector<46x5xf32>, vector<46x16xf32>, vector<46x5xf32> -> vector<46x26xf32>
    %9 = vector.extract_strided_slice %8 {offsets = [0, 0], sizes = [46, 16], strides = [1, 1]} : vector<46x26xf32> to vector<46x16xf32>
    %10 = vector.extract_strided_slice %8 {offsets = [0, 1], sizes = [46, 16], strides = [1, 1]} : vector<46x26xf32> to vector<46x16xf32>
    %11 = vector.extract_strided_slice %8 {offsets = [0, 2], sizes = [46, 16], strides = [1, 1]} : vector<46x26xf32> to vector<46x16xf32>
    %12 = vector.extract_strided_slice %8 {offsets = [0, 3], sizes = [46, 16], strides = [1, 1]} : vector<46x26xf32> to vector<46x16xf32>
    %13 = vector.extract_strided_slice %8 {offsets = [0, 4], sizes = [46, 16], strides = [1, 1]} : vector<46x26xf32> to vector<46x16xf32>
    %14 = vector.extract_strided_slice %8 {offsets = [0, 5], sizes = [46, 16], strides = [1, 1]} : vector<46x26xf32> to vector<46x16xf32>
    %15 = vector.extract_strided_slice %8 {offsets = [0, 6], sizes = [46, 16], strides = [1, 1]} : vector<46x26xf32> to vector<46x16xf32>
    %16 = vector.extract_strided_slice %8 {offsets = [0, 7], sizes = [46, 16], strides = [1, 1]} : vector<46x26xf32> to vector<46x16xf32>
    %17 = vector.extract_strided_slice %8 {offsets = [0, 8], sizes = [46, 16], strides = [1, 1]} : vector<46x26xf32> to vector<46x16xf32>
    %18 = vector.extract_strided_slice %8 {offsets = [0, 9], sizes = [46, 16], strides = [1, 1]} : vector<46x26xf32> to vector<46x16xf32>
    %19 = vector.extract_strided_slice %8 {offsets = [0, 10], sizes = [46, 16], strides = [1, 1]} : vector<46x26xf32> to vector<46x16xf32>
    %20 = tpu.concatenate %9, %10, %11, %12, %13, %14, %15, %16, %17, %18, %19 in 0 : vector<46x16xf32>, vector<46x16xf32>, vector<46x16xf32>, vector<46x16xf32>, vector<46x16xf32>, vector<46x16xf32>, vector<46x16xf32>, vector<46x16xf32>, vector<46x16xf32>, vector<46x16xf32>, vector<46x16xf32> -> vector<506x16xf32>
    %cst_10 = arith.constant dense<0.000000e+00> : vector<10x16xf32>
    %21 = tpu.matmul %0, %20, %cst_10 {dimension_numbers = #tpu.dot_dimension_numbers<[1], [0], [0], [1], [0, 0, 1, 1], [], []>} : vector<10x506xf32>, vector<506x16xf32>, vector<10x16xf32> -> vector<10x16xf32>
    %22 = vector.broadcast %6 : vector<10x1xf32> to vector<10x16xf32>
    %23 = arith.addf %21, %22 : vector<10x16xf32>
    %cst_11 = arith.constant 0.000000e+00 : f32
    %24 = vector.broadcast %cst_11 : f32 to vector<10x16xf32>
    %25 = arith.maximumf %23, %24 : vector<10x16xf32>
    %26 = vector.extract_strided_slice %1 {offsets = [0, 0, 0], sizes = [1, 10, 110], strides = [1, 1, 1]} : vector<4x10x110xf32> to vector<1x10x110xf32>
    %27 = vector.shape_cast %26 : vector<1x10x110xf32> to vector<10x110xf32>
    %28 = vector.extract_strided_slice %2 {offsets = [1, 0, 0], sizes = [1, 10, 1], strides = [1, 1, 1]} : vector<5x10x1xf32> to vector<1x10x1xf32>
    %29 = vector.shape_cast %28 : vector<1x10x1xf32> to vector<10x1xf32>
    %cst_12 = arith.constant 0.000000e+00 : f32
    %30 = vector.broadcast %cst_12 : f32 to vector<10x5xf32>
    %31 = tpu.concatenate %30, %25, %30 in 1 : vector<10x5xf32>, vector<10x16xf32>, vector<10x5xf32> -> vector<10x26xf32>
    %32 = vector.extract_strided_slice %31 {offsets = [0, 0], sizes = [10, 16], strides = [1, 1]} : vector<10x26xf32> to vector<10x16xf32>
    %33 = vector.extract_strided_slice %31 {offsets = [0, 1], sizes = [10, 16], strides = [1, 1]} : vector<10x26xf32> to vector<10x16xf32>
    %34 = vector.extract_strided_slice %31 {offsets = [0, 2], sizes = [10, 16], strides = [1, 1]} : vector<10x26xf32> to vector<10x16xf32>
    %35 = vector.extract_strided_slice %31 {offsets = [0, 3], sizes = [10, 16], strides = [1, 1]} : vector<10x26xf32> to vector<10x16xf32>
    %36 = vector.extract_strided_slice %31 {offsets = [0, 4], sizes = [10, 16], strides = [1, 1]} : vector<10x26xf32> to vector<10x16xf32>
    %37 = vector.extract_strided_slice %31 {offsets = [0, 5], sizes = [10, 16], strides = [1, 1]} : vector<10x26xf32> to vector<10x16xf32>
    %38 = vector.extract_strided_slice %31 {offsets = [0, 6], sizes = [10, 16], strides = [1, 1]} : vector<10x26xf32> to vector<10x16xf32>
    %39 = vector.extract_strided_slice %31 {offsets = [0, 7], sizes = [10, 16], strides = [1, 1]} : vector<10x26xf32> to vector<10x16xf32>
    %40 = vector.extract_strided_slice %31 {offsets = [0, 8], sizes = [10, 16], strides = [1, 1]} : vector<10x26xf32> to vector<10x16xf32>
    %41 = vector.extract_strided_slice %31 {offsets = [0, 9], sizes = [10, 16], strides = [1, 1]} : vector<10x26xf32> to vector<10x16xf32>
    %42 = vector.extract_strided_slice %31 {offsets = [0, 10], sizes = [10, 16], strides = [1, 1]} : vector<10x26xf32> to vector<10x16xf32>
    %43 = tpu.concatenate %32, %33, %34, %35, %36, %37, %38, %39, %40, %41, %42 in 0 : vector<10x16xf32>, vector<10x16xf32>, vector<10x16xf32>, vector<10x16xf32>, vector<10x16xf32>, vector<10x16xf32>, vector<10x16xf32>, vector<10x16xf32>, vector<10x16xf32>, vector<10x16xf32>, vector<10x16xf32> -> vector<110x16xf32>
    %cst_13 = arith.constant dense<0.000000e+00> : vector<10x16xf32>
    %44 = tpu.matmul %27, %43, %cst_13 {dimension_numbers = #tpu.dot_dimension_numbers<[1], [0], [0], [1], [0, 0, 1, 1], [], []>} : vector<10x110xf32>, vector<110x16xf32>, vector<10x16xf32> -> vector<10x16xf32>
    %45 = vector.broadcast %29 : vector<10x1xf32> to vector<10x16xf32>
    %46 = arith.addf %44, %45 : vector<10x16xf32>
    %cst_14 = arith.constant 0.000000e+00 : f32
    %47 = vector.broadcast %cst_14 : f32 to vector<10x16xf32>
    %48 = arith.maximumf %46, %47 : vector<10x16xf32>
    %49 = vector.extract_strided_slice %1 {offsets = [1, 0, 0], sizes = [1, 10, 110], strides = [1, 1, 1]} : vector<4x10x110xf32> to vector<1x10x110xf32>
    %50 = vector.shape_cast %49 : vector<1x10x110xf32> to vector<10x110xf32>
    %51 = vector.extract_strided_slice %2 {offsets = [2, 0, 0], sizes = [1, 10, 1], strides = [1, 1, 1]} : vector<5x10x1xf32> to vector<1x10x1xf32>
    %52 = vector.shape_cast %51 : vector<1x10x1xf32> to vector<10x1xf32>
    %cst_15 = arith.constant 0.000000e+00 : f32
    %53 = vector.broadcast %cst_15 : f32 to vector<10x5xf32>
    %54 = tpu.concatenate %53, %48, %53 in 1 : vector<10x5xf32>, vector<10x16xf32>, vector<10x5xf32> -> vector<10x26xf32>
    %55 = vector.extract_strided_slice %54 {offsets = [0, 0], sizes = [10, 16], strides = [1, 1]} : vector<10x26xf32> to vector<10x16xf32>
    %56 = vector.extract_strided_slice %54 {offsets = [0, 1], sizes = [10, 16], strides = [1, 1]} : vector<10x26xf32> to vector<10x16xf32>
    %57 = vector.extract_strided_slice %54 {offsets = [0, 2], sizes = [10, 16], strides = [1, 1]} : vector<10x26xf32> to vector<10x16xf32>
    %58 = vector.extract_strided_slice %54 {offsets = [0, 3], sizes = [10, 16], strides = [1, 1]} : vector<10x26xf32> to vector<10x16xf32>
    %59 = vector.extract_strided_slice %54 {offsets = [0, 4], sizes = [10, 16], strides = [1, 1]} : vector<10x26xf32> to vector<10x16xf32>
    %60 = vector.extract_strided_slice %54 {offsets = [0, 5], sizes = [10, 16], strides = [1, 1]} : vector<10x26xf32> to vector<10x16xf32>
    %61 = vector.extract_strided_slice %54 {offsets = [0, 6], sizes = [10, 16], strides = [1, 1]} : vector<10x26xf32> to vector<10x16xf32>
    %62 = vector.extract_strided_slice %54 {offsets = [0, 7], sizes = [10, 16], strides = [1, 1]} : vector<10x26xf32> to vector<10x16xf32>
    %63 = vector.extract_strided_slice %54 {offsets = [0, 8], sizes = [10, 16], strides = [1, 1]} : vector<10x26xf32> to vector<10x16xf32>
    %64 = vector.extract_strided_slice %54 {offsets = [0, 9], sizes = [10, 16], strides = [1, 1]} : vector<10x26xf32> to vector<10x16xf32>
    %65 = vector.extract_strided_slice %54 {offsets = [0, 10], sizes = [10, 16], strides = [1, 1]} : vector<10x26xf32> to vector<10x16xf32>
    %66 = tpu.concatenate %55, %56, %57, %58, %59, %60, %61, %62, %63, %64, %65 in 0 : vector<10x16xf32>, vector<10x16xf32>, vector<10x16xf32>, vector<10x16xf32>, vector<10x16xf32>, vector<10x16xf32>, vector<10x16xf32>, vector<10x16xf32>, vector<10x16xf32>, vector<10x16xf32>, vector<10x16xf32> -> vector<110x16xf32>
    %cst_16 = arith.constant dense<0.000000e+00> : vector<10x16xf32>
    %67 = tpu.matmul %50, %66, %cst_16 {dimension_numbers = #tpu.dot_dimension_numbers<[1], [0], [0], [1], [0, 0, 1, 1], [], []>} : vector<10x110xf32>, vector<110x16xf32>, vector<10x16xf32> -> vector<10x16xf32>
    %68 = vector.broadcast %52 : vector<10x1xf32> to vector<10x16xf32>
    %69 = arith.addf %67, %68 : vector<10x16xf32>
    %cst_17 = arith.constant 0.000000e+00 : f32
    %70 = vector.broadcast %cst_17 : f32 to vector<10x16xf32>
    %71 = arith.maximumf %69, %70 : vector<10x16xf32>
    %72 = vector.extract_strided_slice %1 {offsets = [2, 0, 0], sizes = [1, 10, 110], strides = [1, 1, 1]} : vector<4x10x110xf32> to vector<1x10x110xf32>
    %73 = vector.shape_cast %72 : vector<1x10x110xf32> to vector<10x110xf32>
    %74 = vector.extract_strided_slice %2 {offsets = [3, 0, 0], sizes = [1, 10, 1], strides = [1, 1, 1]} : vector<5x10x1xf32> to vector<1x10x1xf32>
    %75 = vector.shape_cast %74 : vector<1x10x1xf32> to vector<10x1xf32>
    %cst_18 = arith.constant 0.000000e+00 : f32
    %76 = vector.broadcast %cst_18 : f32 to vector<10x5xf32>
    %77 = tpu.concatenate %76, %71, %76 in 1 : vector<10x5xf32>, vector<10x16xf32>, vector<10x5xf32> -> vector<10x26xf32>
    %78 = vector.extract_strided_slice %77 {offsets = [0, 0], sizes = [10, 16], strides = [1, 1]} : vector<10x26xf32> to vector<10x16xf32>
    %79 = vector.extract_strided_slice %77 {offsets = [0, 1], sizes = [10, 16], strides = [1, 1]} : vector<10x26xf32> to vector<10x16xf32>
    %80 = vector.extract_strided_slice %77 {offsets = [0, 2], sizes = [10, 16], strides = [1, 1]} : vector<10x26xf32> to vector<10x16xf32>
    %81 = vector.extract_strided_slice %77 {offsets = [0, 3], sizes = [10, 16], strides = [1, 1]} : vector<10x26xf32> to vector<10x16xf32>
    %82 = vector.extract_strided_slice %77 {offsets = [0, 4], sizes = [10, 16], strides = [1, 1]} : vector<10x26xf32> to vector<10x16xf32>
    %83 = vector.extract_strided_slice %77 {offsets = [0, 5], sizes = [10, 16], strides = [1, 1]} : vector<10x26xf32> to vector<10x16xf32>
    %84 = vector.extract_strided_slice %77 {offsets = [0, 6], sizes = [10, 16], strides = [1, 1]} : vector<10x26xf32> to vector<10x16xf32>
    %85 = vector.extract_strided_slice %77 {offsets = [0, 7], sizes = [10, 16], strides = [1, 1]} : vector<10x26xf32> to vector<10x16xf32>
    %86 = vector.extract_strided_slice %77 {offsets = [0, 8], sizes = [10, 16], strides = [1, 1]} : vector<10x26xf32> to vector<10x16xf32>
    %87 = vector.extract_strided_slice %77 {offsets = [0, 9], sizes = [10, 16], strides = [1, 1]} : vector<10x26xf32> to vector<10x16xf32>
    %88 = vector.extract_strided_slice %77 {offsets = [0, 10], sizes = [10, 16], strides = [1, 1]} : vector<10x26xf32> to vector<10x16xf32>
    %89 = tpu.concatenate %78, %79, %80, %81, %82, %83, %84, %85, %86, %87, %88 in 0 : vector<10x16xf32>, vector<10x16xf32>, vector<10x16xf32>, vector<10x16xf32>, vector<10x16xf32>, vector<10x16xf32>, vector<10x16xf32>, vector<10x16xf32>, vector<10x16xf32>, vector<10x16xf32>, vector<10x16xf32> -> vector<110x16xf32>
    %cst_19 = arith.constant dense<0.000000e+00> : vector<10x16xf32>
    %90 = tpu.matmul %73, %89, %cst_19 {dimension_numbers = #tpu.dot_dimension_numbers<[1], [0], [0], [1], [0, 0, 1, 1], [], []>} : vector<10x110xf32>, vector<110x16xf32>, vector<10x16xf32> -> vector<10x16xf32>
    %91 = vector.broadcast %75 : vector<10x1xf32> to vector<10x16xf32>
    %92 = arith.addf %90, %91 : vector<10x16xf32>
    %cst_20 = arith.constant 0.000000e+00 : f32
    %93 = vector.broadcast %cst_20 : f32 to vector<10x16xf32>
    %94 = arith.maximumf %92, %93 : vector<10x16xf32>
    %95 = vector.extract_strided_slice %1 {offsets = [3, 0, 0], sizes = [1, 10, 110], strides = [1, 1, 1]} : vector<4x10x110xf32> to vector<1x10x110xf32>
    %96 = vector.shape_cast %95 : vector<1x10x110xf32> to vector<10x110xf32>
    %97 = vector.extract_strided_slice %2 {offsets = [4, 0, 0], sizes = [1, 10, 1], strides = [1, 1, 1]} : vector<5x10x1xf32> to vector<1x10x1xf32>
    %98 = vector.shape_cast %97 : vector<1x10x1xf32> to vector<10x1xf32>
    %cst_21 = arith.constant 0.000000e+00 : f32
    %99 = vector.broadcast %cst_21 : f32 to vector<10x5xf32>
    %100 = tpu.concatenate %99, %94, %99 in 1 : vector<10x5xf32>, vector<10x16xf32>, vector<10x5xf32> -> vector<10x26xf32>
    %101 = vector.extract_strided_slice %100 {offsets = [0, 0], sizes = [10, 16], strides = [1, 1]} : vector<10x26xf32> to vector<10x16xf32>
    %102 = vector.extract_strided_slice %100 {offsets = [0, 1], sizes = [10, 16], strides = [1, 1]} : vector<10x26xf32> to vector<10x16xf32>
    %103 = vector.extract_strided_slice %100 {offsets = [0, 2], sizes = [10, 16], strides = [1, 1]} : vector<10x26xf32> to vector<10x16xf32>
    %104 = vector.extract_strided_slice %100 {offsets = [0, 3], sizes = [10, 16], strides = [1, 1]} : vector<10x26xf32> to vector<10x16xf32>
    %105 = vector.extract_strided_slice %100 {offsets = [0, 4], sizes = [10, 16], strides = [1, 1]} : vector<10x26xf32> to vector<10x16xf32>
    %106 = vector.extract_strided_slice %100 {offsets = [0, 5], sizes = [10, 16], strides = [1, 1]} : vector<10x26xf32> to vector<10x16xf32>
    %107 = vector.extract_strided_slice %100 {offsets = [0, 6], sizes = [10, 16], strides = [1, 1]} : vector<10x26xf32> to vector<10x16xf32>
    %108 = vector.extract_strided_slice %100 {offsets = [0, 7], sizes = [10, 16], strides = [1, 1]} : vector<10x26xf32> to vector<10x16xf32>
    %109 = vector.extract_strided_slice %100 {offsets = [0, 8], sizes = [10, 16], strides = [1, 1]} : vector<10x26xf32> to vector<10x16xf32>
    %110 = vector.extract_strided_slice %100 {offsets = [0, 9], sizes = [10, 16], strides = [1, 1]} : vector<10x26xf32> to vector<10x16xf32>
    %111 = vector.extract_strided_slice %100 {offsets = [0, 10], sizes = [10, 16], strides = [1, 1]} : vector<10x26xf32> to vector<10x16xf32>
    %112 = tpu.concatenate %101, %102, %103, %104, %105, %106, %107, %108, %109, %110, %111 in 0 : vector<10x16xf32>, vector<10x16xf32>, vector<10x16xf32>, vector<10x16xf32>, vector<10x16xf32>, vector<10x16xf32>, vector<10x16xf32>, vector<10x16xf32>, vector<10x16xf32>, vector<10x16xf32>, vector<10x16xf32> -> vector<110x16xf32>
    %cst_22 = arith.constant dense<0.000000e+00> : vector<10x16xf32>
    %113 = tpu.matmul %96, %112, %cst_22 {dimension_numbers = #tpu.dot_dimension_numbers<[1], [0], [0], [1], [0, 0, 1, 1], [], []>} : vector<10x110xf32>, vector<110x16xf32>, vector<10x16xf32> -> vector<10x16xf32>
    %114 = vector.broadcast %98 : vector<10x1xf32> to vector<10x16xf32>
    %115 = arith.addf %113, %114 : vector<10x16xf32>
    %cst_23 = arith.constant 0.000000e+00 : f32
    %116 = vector.broadcast %cst_23 : f32 to vector<10x16xf32>
    %117 = arith.maximumf %115, %116 : vector<10x16xf32>
    %118 = vector.extract_strided_slice %117 {offsets = [0, 0], sizes = [9, 16], strides = [1, 1]} : vector<10x16xf32> to vector<9x16xf32>
    %c0_24 = arith.constant 0 : index
    %c0_25 = arith.constant 0 : index
    %c0_26 = arith.constant 0 : index
    %119 = vector.load %arg5[%c0_24, %c0_25, %c0_26] : memref<2x9x16xf32, #tpu.memory_space<vmem>>, vector<1x9x16xf32>
    %120 = vector.shape_cast %119 : vector<1x9x16xf32> to vector<9x16xf32>
    %121 = vector.shape_cast %118 : vector<9x16xf32> to vector<1x9x16xf32>
    tpu.vector_store %arg5[%c0_24, %c0_25, %c0_26], %121 {strides = array<i32>} : memref<2x9x16xf32, #tpu.memory_space<vmem>>, vector<1x9x16xf32>,
    %c1 = arith.constant 1 : index
    %c0_27 = arith.constant 0 : index
    %c0_28 = arith.constant 0 : index
    %122 = vector.load %arg1[%c1, %c0_27, %c0_28] : memref<2x46x16xf32, #tpu.memory_space<vmem>>, vector<1x46x16xf32>
    %123 = vector.shape_cast %122 : vector<1x46x16xf32> to vector<46x16xf32>
    %124 = vector.extract_strided_slice %2 {offsets = [0, 0, 0], sizes = [1, 10, 1], strides = [1, 1, 1]} : vector<5x10x1xf32> to vector<1x10x1xf32>
    %125 = vector.shape_cast %124 : vector<1x10x1xf32> to vector<10x1xf32>
    %cst_29 = arith.constant 0.000000e+00 : f32
    %126 = vector.broadcast %cst_29 : f32 to vector<46x5xf32>
    %127 = tpu.concatenate %126, %123, %126 in 1 : vector<46x5xf32>, vector<46x16xf32>, vector<46x5xf32> -> vector<46x26xf32>
    %128 = vector.extract_strided_slice %127 {offsets = [0, 0], sizes = [46, 16], strides = [1, 1]} : vector<46x26xf32> to vector<46x16xf32>
    %129 = vector.extract_strided_slice %127 {offsets = [0, 1], sizes = [46, 16], strides = [1, 1]} : vector<46x26xf32> to vector<46x16xf32>
    %130 = vector.extract_strided_slice %127 {offsets = [0, 2], sizes = [46, 16], strides = [1, 1]} : vector<46x26xf32> to vector<46x16xf32>
    %131 = vector.extract_strided_slice %127 {offsets = [0, 3], sizes = [46, 16], strides = [1, 1]} : vector<46x26xf32> to vector<46x16xf32>
    %132 = vector.extract_strided_slice %127 {offsets = [0, 4], sizes = [46, 16], strides = [1, 1]} : vector<46x26xf32> to vector<46x16xf32>
    %133 = vector.extract_strided_slice %127 {offsets = [0, 5], sizes = [46, 16], strides = [1, 1]} : vector<46x26xf32> to vector<46x16xf32>
    %134 = vector.extract_strided_slice %127 {offsets = [0, 6], sizes = [46, 16], strides = [1, 1]} : vector<46x26xf32> to vector<46x16xf32>
    %135 = vector.extract_strided_slice %127 {offsets = [0, 7], sizes = [46, 16], strides = [1, 1]} : vector<46x26xf32> to vector<46x16xf32>
    %136 = vector.extract_strided_slice %127 {offsets = [0, 8], sizes = [46, 16], strides = [1, 1]} : vector<46x26xf32> to vector<46x16xf32>
    %137 = vector.extract_strided_slice %127 {offsets = [0, 9], sizes = [46, 16], strides = [1, 1]} : vector<46x26xf32> to vector<46x16xf32>
    %138 = vector.extract_strided_slice %127 {offsets = [0, 10], sizes = [46, 16], strides = [1, 1]} : vector<46x26xf32> to vector<46x16xf32>
    %139 = tpu.concatenate %128, %129, %130, %131, %132, %133, %134, %135, %136, %137, %138 in 0 : vector<46x16xf32>, vector<46x16xf32>, vector<46x16xf32>, vector<46x16xf32>, vector<46x16xf32>, vector<46x16xf32>, vector<46x16xf32>, vector<46x16xf32>, vector<46x16xf32>, vector<46x16xf32>, vector<46x16xf32> -> vector<506x16xf32>
    %cst_30 = arith.constant dense<0.000000e+00> : vector<10x16xf32>
    %140 = tpu.matmul %0, %139, %cst_30 {dimension_numbers = #tpu.dot_dimension_numbers<[1], [0], [0], [1], [0, 0, 1, 1], [], []>} : vector<10x506xf32>, vector<506x16xf32>, vector<10x16xf32> -> vector<10x16xf32>
    %141 = vector.broadcast %125 : vector<10x1xf32> to vector<10x16xf32>
    %142 = arith.addf %140, %141 : vector<10x16xf32>
    %cst_31 = arith.constant 0.000000e+00 : f32
    %143 = vector.broadcast %cst_31 : f32 to vector<10x16xf32>
    %144 = arith.maximumf %142, %143 : vector<10x16xf32>
    %145 = vector.extract_strided_slice %1 {offsets = [0, 0, 0], sizes = [1, 10, 110], strides = [1, 1, 1]} : vector<4x10x110xf32> to vector<1x10x110xf32>
    %146 = vector.shape_cast %145 : vector<1x10x110xf32> to vector<10x110xf32>
    %147 = vector.extract_strided_slice %2 {offsets = [1, 0, 0], sizes = [1, 10, 1], strides = [1, 1, 1]} : vector<5x10x1xf32> to vector<1x10x1xf32>
    %148 = vector.shape_cast %147 : vector<1x10x1xf32> to vector<10x1xf32>
    %cst_32 = arith.constant 0.000000e+00 : f32
    %149 = vector.broadcast %cst_32 : f32 to vector<10x5xf32>
    %150 = tpu.concatenate %149, %144, %149 in 1 : vector<10x5xf32>, vector<10x16xf32>, vector<10x5xf32> -> vector<10x26xf32>
    %151 = vector.extract_strided_slice %150 {offsets = [0, 0], sizes = [10, 16], strides = [1, 1]} : vector<10x26xf32> to vector<10x16xf32>
    %152 = vector.extract_strided_slice %150 {offsets = [0, 1], sizes = [10, 16], strides = [1, 1]} : vector<10x26xf32> to vector<10x16xf32>
    %153 = vector.extract_strided_slice %150 {offsets = [0, 2], sizes = [10, 16], strides = [1, 1]} : vector<10x26xf32> to vector<10x16xf32>
    %154 = vector.extract_strided_slice %150 {offsets = [0, 3], sizes = [10, 16], strides = [1, 1]} : vector<10x26xf32> to vector<10x16xf32>
    %155 = vector.extract_strided_slice %150 {offsets = [0, 4], sizes = [10, 16], strides = [1, 1]} : vector<10x26xf32> to vector<10x16xf32>
    %156 = vector.extract_strided_slice %150 {offsets = [0, 5], sizes = [10, 16], strides = [1, 1]} : vector<10x26xf32> to vector<10x16xf32>
    %157 = vector.extract_strided_slice %150 {offsets = [0, 6], sizes = [10, 16], strides = [1, 1]} : vector<10x26xf32> to vector<10x16xf32>
    %158 = vector.extract_strided_slice %150 {offsets = [0, 7], sizes = [10, 16], strides = [1, 1]} : vector<10x26xf32> to vector<10x16xf32>
    %159 = vector.extract_strided_slice %150 {offsets = [0, 8], sizes = [10, 16], strides = [1, 1]} : vector<10x26xf32> to vector<10x16xf32>
    %160 = vector.extract_strided_slice %150 {offsets = [0, 9], sizes = [10, 16], strides = [1, 1]} : vector<10x26xf32> to vector<10x16xf32>
    %161 = vector.extract_strided_slice %150 {offsets = [0, 10], sizes = [10, 16], strides = [1, 1]} : vector<10x26xf32> to vector<10x16xf32>
    %162 = tpu.concatenate %151, %152, %153, %154, %155, %156, %157, %158, %159, %160, %161 in 0 : vector<10x16xf32>, vector<10x16xf32>, vector<10x16xf32>, vector<10x16xf32>, vector<10x16xf32>, vector<10x16xf32>, vector<10x16xf32>, vector<10x16xf32>, vector<10x16xf32>, vector<10x16xf32>, vector<10x16xf32> -> vector<110x16xf32>
    %cst_33 = arith.constant dense<0.000000e+00> : vector<10x16xf32>
    %163 = tpu.matmul %146, %162, %cst_33 {dimension_numbers = #tpu.dot_dimension_numbers<[1], [0], [0], [1], [0, 0, 1, 1], [], []>} : vector<10x110xf32>, vector<110x16xf32>, vector<10x16xf32> -> vector<10x16xf32>
    %164 = vector.broadcast %148 : vector<10x1xf32> to vector<10x16xf32>
    %165 = arith.addf %163, %164 : vector<10x16xf32>
    %cst_34 = arith.constant 0.000000e+00 : f32
    %166 = vector.broadcast %cst_34 : f32 to vector<10x16xf32>
    %167 = arith.maximumf %165, %166 : vector<10x16xf32>
    %168 = vector.extract_strided_slice %1 {offsets = [1, 0, 0], sizes = [1, 10, 110], strides = [1, 1, 1]} : vector<4x10x110xf32> to vector<1x10x110xf32>
    %169 = vector.shape_cast %168 : vector<1x10x110xf32> to vector<10x110xf32>
    %170 = vector.extract_strided_slice %2 {offsets = [2, 0, 0], sizes = [1, 10, 1], strides = [1, 1, 1]} : vector<5x10x1xf32> to vector<1x10x1xf32>
    %171 = vector.shape_cast %170 : vector<1x10x1xf32> to vector<10x1xf32>
    %cst_35 = arith.constant 0.000000e+00 : f32
    %172 = vector.broadcast %cst_35 : f32 to vector<10x5xf32>
    %173 = tpu.concatenate %172, %167, %172 in 1 : vector<10x5xf32>, vector<10x16xf32>, vector<10x5xf32> -> vector<10x26xf32>
    %174 = vector.extract_strided_slice %173 {offsets = [0, 0], sizes = [10, 16], strides = [1, 1]} : vector<10x26xf32> to vector<10x16xf32>
    %175 = vector.extract_strided_slice %173 {offsets = [0, 1], sizes = [10, 16], strides = [1, 1]} : vector<10x26xf32> to vector<10x16xf32>
    %176 = vector.extract_strided_slice %173 {offsets = [0, 2], sizes = [10, 16], strides = [1, 1]} : vector<10x26xf32> to vector<10x16xf32>
    %177 = vector.extract_strided_slice %173 {offsets = [0, 3], sizes = [10, 16], strides = [1, 1]} : vector<10x26xf32> to vector<10x16xf32>
    %178 = vector.extract_strided_slice %173 {offsets = [0, 4], sizes = [10, 16], strides = [1, 1]} : vector<10x26xf32> to vector<10x16xf32>
    %179 = vector.extract_strided_slice %173 {offsets = [0, 5], sizes = [10, 16], strides = [1, 1]} : vector<10x26xf32> to vector<10x16xf32>
    %180 = vector.extract_strided_slice %173 {offsets = [0, 6], sizes = [10, 16], strides = [1, 1]} : vector<10x26xf32> to vector<10x16xf32>
    %181 = vector.extract_strided_slice %173 {offsets = [0, 7], sizes = [10, 16], strides = [1, 1]} : vector<10x26xf32> to vector<10x16xf32>
    %182 = vector.extract_strided_slice %173 {offsets = [0, 8], sizes = [10, 16], strides = [1, 1]} : vector<10x26xf32> to vector<10x16xf32>
    %183 = vector.extract_strided_slice %173 {offsets = [0, 9], sizes = [10, 16], strides = [1, 1]} : vector<10x26xf32> to vector<10x16xf32>
    %184 = vector.extract_strided_slice %173 {offsets = [0, 10], sizes = [10, 16], strides = [1, 1]} : vector<10x26xf32> to vector<10x16xf32>
    %185 = tpu.concatenate %174, %175, %176, %177, %178, %179, %180, %181, %182, %183, %184 in 0 : vector<10x16xf32>, vector<10x16xf32>, vector<10x16xf32>, vector<10x16xf32>, vector<10x16xf32>, vector<10x16xf32>, vector<10x16xf32>, vector<10x16xf32>, vector<10x16xf32>, vector<10x16xf32>, vector<10x16xf32> -> vector<110x16xf32>
    %cst_36 = arith.constant dense<0.000000e+00> : vector<10x16xf32>
    %186 = tpu.matmul %169, %185, %cst_36 {dimension_numbers = #tpu.dot_dimension_numbers<[1], [0], [0], [1], [0, 0, 1, 1], [], []>} : vector<10x110xf32>, vector<110x16xf32>, vector<10x16xf32> -> vector<10x16xf32>
    %187 = vector.broadcast %171 : vector<10x1xf32> to vector<10x16xf32>
    %188 = arith.addf %186, %187 : vector<10x16xf32>
    %cst_37 = arith.constant 0.000000e+00 : f32
    %189 = vector.broadcast %cst_37 : f32 to vector<10x16xf32>
    %190 = arith.maximumf %188, %189 : vector<10x16xf32>
    %191 = vector.extract_strided_slice %1 {offsets = [2, 0, 0], sizes = [1, 10, 110], strides = [1, 1, 1]} : vector<4x10x110xf32> to vector<1x10x110xf32>
    %192 = vector.shape_cast %191 : vector<1x10x110xf32> to vector<10x110xf32>
    %193 = vector.extract_strided_slice %2 {offsets = [3, 0, 0], sizes = [1, 10, 1], strides = [1, 1, 1]} : vector<5x10x1xf32> to vector<1x10x1xf32>
    %194 = vector.shape_cast %193 : vector<1x10x1xf32> to vector<10x1xf32>
    %cst_38 = arith.constant 0.000000e+00 : f32
    %195 = vector.broadcast %cst_38 : f32 to vector<10x5xf32>
    %196 = tpu.concatenate %195, %190, %195 in 1 : vector<10x5xf32>, vector<10x16xf32>, vector<10x5xf32> -> vector<10x26xf32>
    %197 = vector.extract_strided_slice %196 {offsets = [0, 0], sizes = [10, 16], strides = [1, 1]} : vector<10x26xf32> to vector<10x16xf32>
    %198 = vector.extract_strided_slice %196 {offsets = [0, 1], sizes = [10, 16], strides = [1, 1]} : vector<10x26xf32> to vector<10x16xf32>
    %199 = vector.extract_strided_slice %196 {offsets = [0, 2], sizes = [10, 16], strides = [1, 1]} : vector<10x26xf32> to vector<10x16xf32>
    %200 = vector.extract_strided_slice %196 {offsets = [0, 3], sizes = [10, 16], strides = [1, 1]} : vector<10x26xf32> to vector<10x16xf32>
    %201 = vector.extract_strided_slice %196 {offsets = [0, 4], sizes = [10, 16], strides = [1, 1]} : vector<10x26xf32> to vector<10x16xf32>
    %202 = vector.extract_strided_slice %196 {offsets = [0, 5], sizes = [10, 16], strides = [1, 1]} : vector<10x26xf32> to vector<10x16xf32>
    %203 = vector.extract_strided_slice %196 {offsets = [0, 6], sizes = [10, 16], strides = [1, 1]} : vector<10x26xf32> to vector<10x16xf32>
    %204 = vector.extract_strided_slice %196 {offsets = [0, 7], sizes = [10, 16], strides = [1, 1]} : vector<10x26xf32> to vector<10x16xf32>
    %205 = vector.extract_strided_slice %196 {offsets = [0, 8], sizes = [10, 16], strides = [1, 1]} : vector<10x26xf32> to vector<10x16xf32>
    %206 = vector.extract_strided_slice %196 {offsets = [0, 9], sizes = [10, 16], strides = [1, 1]} : vector<10x26xf32> to vector<10x16xf32>
    %207 = vector.extract_strided_slice %196 {offsets = [0, 10], sizes = [10, 16], strides = [1, 1]} : vector<10x26xf32> to vector<10x16xf32>
    %208 = tpu.concatenate %197, %198, %199, %200, %201, %202, %203, %204, %205, %206, %207 in 0 : vector<10x16xf32>, vector<10x16xf32>, vector<10x16xf32>, vector<10x16xf32>, vector<10x16xf32>, vector<10x16xf32>, vector<10x16xf32>, vector<10x16xf32>, vector<10x16xf32>, vector<10x16xf32>, vector<10x16xf32> -> vector<110x16xf32>
    %cst_39 = arith.constant dense<0.000000e+00> : vector<10x16xf32>
    %209 = tpu.matmul %192, %208, %cst_39 {dimension_numbers = #tpu.dot_dimension_numbers<[1], [0], [0], [1], [0, 0, 1, 1], [], []>} : vector<10x110xf32>, vector<110x16xf32>, vector<10x16xf32> -> vector<10x16xf32>
    %210 = vector.broadcast %194 : vector<10x1xf32> to vector<10x16xf32>
    %211 = arith.addf %209, %210 : vector<10x16xf32>
    %cst_40 = arith.constant 0.000000e+00 : f32
    %212 = vector.broadcast %cst_40 : f32 to vector<10x16xf32>
    %213 = arith.maximumf %211, %212 : vector<10x16xf32>
    %214 = vector.extract_strided_slice %1 {offsets = [3, 0, 0], sizes = [1, 10, 110], strides = [1, 1, 1]} : vector<4x10x110xf32> to vector<1x10x110xf32>
    %215 = vector.shape_cast %214 : vector<1x10x110xf32> to vector<10x110xf32>
    %216 = vector.extract_strided_slice %2 {offsets = [4, 0, 0], sizes = [1, 10, 1], strides = [1, 1, 1]} : vector<5x10x1xf32> to vector<1x10x1xf32>
    %217 = vector.shape_cast %216 : vector<1x10x1xf32> to vector<10x1xf32>
    %cst_41 = arith.constant 0.000000e+00 : f32
    %218 = vector.broadcast %cst_41 : f32 to vector<10x5xf32>
    %219 = tpu.concatenate %218, %213, %218 in 1 : vector<10x5xf32>, vector<10x16xf32>, vector<10x5xf32> -> vector<10x26xf32>
    %220 = vector.extract_strided_slice %219 {offsets = [0, 0], sizes = [10, 16], strides = [1, 1]} : vector<10x26xf32> to vector<10x16xf32>
    %221 = vector.extract_strided_slice %219 {offsets = [0, 1], sizes = [10, 16], strides = [1, 1]} : vector<10x26xf32> to vector<10x16xf32>
    %222 = vector.extract_strided_slice %219 {offsets = [0, 2], sizes = [10, 16], strides = [1, 1]} : vector<10x26xf32> to vector<10x16xf32>
    %223 = vector.extract_strided_slice %219 {offsets = [0, 3], sizes = [10, 16], strides = [1, 1]} : vector<10x26xf32> to vector<10x16xf32>
    %224 = vector.extract_strided_slice %219 {offsets = [0, 4], sizes = [10, 16], strides = [1, 1]} : vector<10x26xf32> to vector<10x16xf32>
    %225 = vector.extract_strided_slice %219 {offsets = [0, 5], sizes = [10, 16], strides = [1, 1]} : vector<10x26xf32> to vector<10x16xf32>
    %226 = vector.extract_strided_slice %219 {offsets = [0, 6], sizes = [10, 16], strides = [1, 1]} : vector<10x26xf32> to vector<10x16xf32>
    %227 = vector.extract_strided_slice %219 {offsets = [0, 7], sizes = [10, 16], strides = [1, 1]} : vector<10x26xf32> to vector<10x16xf32>
    %228 = vector.extract_strided_slice %219 {offsets = [0, 8], sizes = [10, 16], strides = [1, 1]} : vector<10x26xf32> to vector<10x16xf32>
    %229 = vector.extract_strided_slice %219 {offsets = [0, 9], sizes = [10, 16], strides = [1, 1]} : vector<10x26xf32> to vector<10x16xf32>
    %230 = vector.extract_strided_slice %219 {offsets = [0, 10], sizes = [10, 16], strides = [1, 1]} : vector<10x26xf32> to vector<10x16xf32>
    %231 = tpu.concatenate %220, %221, %222, %223, %224, %225, %226, %227, %228, %229, %230 in 0 : vector<10x16xf32>, vector<10x16xf32>, vector<10x16xf32>, vector<10x16xf32>, vector<10x16xf32>, vector<10x16xf32>, vector<10x16xf32>, vector<10x16xf32>, vector<10x16xf32>, vector<10x16xf32>, vector<10x16xf32> -> vector<110x16xf32>
    %cst_42 = arith.constant dense<0.000000e+00> : vector<10x16xf32>
    %232 = tpu.matmul %215, %231, %cst_42 {dimension_numbers = #tpu.dot_dimension_numbers<[1], [0], [0], [1], [0, 0, 1, 1], [], []>} : vector<10x110xf32>, vector<110x16xf32>, vector<10x16xf32> -> vector<10x16xf32>
    %233 = vector.broadcast %217 : vector<10x1xf32> to vector<10x16xf32>
    %234 = arith.addf %232, %233 : vector<10x16xf32>
    %cst_43 = arith.constant 0.000000e+00 : f32
    %235 = vector.broadcast %cst_43 : f32 to vector<10x16xf32>
    %236 = arith.maximumf %234, %235 : vector<10x16xf32>
    %237 = vector.extract_strided_slice %236 {offsets = [0, 0], sizes = [9, 16], strides = [1, 1]} : vector<10x16xf32> to vector<9x16xf32>
    %c1_44 = arith.constant 1 : index
    %c0_45 = arith.constant 0 : index
    %c0_46 = arith.constant 0 : index
    %238 = vector.load %arg5[%c1_44, %c0_45, %c0_46] : memref<2x9x16xf32, #tpu.memory_space<vmem>>, vector<1x9x16xf32>
    %239 = vector.shape_cast %238 : vector<1x9x16xf32> to vector<9x16xf32>
    %240 = vector.shape_cast %237 : vector<9x16xf32> to vector<1x9x16xf32>
    tpu.vector_store %arg5[%c1_44, %c0_45, %c0_46], %240 {strides = array<i32>} : memref<2x9x16xf32, #tpu.memory_space<vmem>>, vector<1x9x16xf32>,
    return
  }
  func.func @transform_0(%arg0: i32) -> (i32, i32, i32) {
    %c0_i32 = arith.constant 0 : i32
    %c0_i32_0 = arith.constant 0 : i32
    %c0_i32_1 = arith.constant 0 : i32
    return %arg0, %c0_i32, %c0_i32_0 : i32, i32, i32
  }
  func.func @transform_1(%arg0: i32) -> (i32, i32) {
    %c0_i32 = arith.constant 0 : i32
    %c0_i32_0 = arith.constant 0 : i32
    %c0_i32_1 = arith.constant 0 : i32
    return %c0_i32, %c0_i32_0 : i32, i32
  }
  func.func @transform_2(%arg0: i32) -> (i32, i32, i32) {
    %c0_i32 = arith.constant 0 : i32
    %c0_i32_0 = arith.constant 0 : i32
    %c0_i32_1 = arith.constant 0 : i32
    %c0_i32_2 = arith.constant 0 : i32
    return %c0_i32, %c0_i32_0, %c0_i32_1 : i32, i32, i32
  }
  func.func @transform_3(%arg0: i32) -> (i32, i32, i32) {
    %c0_i32 = arith.constant 0 : i32
    %c0_i32_0 = arith.constant 0 : i32
    %c0_i32_1 = arith.constant 0 : i32
    %c0_i32_2 = arith.constant 0 : i32
    return %c0_i32, %c0_i32_0, %c0_i32_1 : i32, i32, i32
  }
  func.func @transform_4(%arg0: i32) -> (i32, i32, i32) {
    %c0_i32 = arith.constant 0 : i32
    %c0_i32_0 = arith.constant 0 : i32
    %c0_i32_1 = arith.constant 0 : i32
    return %arg0, %c0_i32, %c0_i32_0 : i32, i32, i32
  }
}

</mosaic_0001>

<bundles_post_ra>
// kernel: tpu_custom_call.1
= control target key start
LH: loop header
LB: loop body
LE: loop exit
PB: predicated region body
PF: predicated region fallthrough
CT: control target
= control target key end

     0   :  { %s4115_s27 = smov 5   ;;  %vm73_vm0 = vcmask 39936   ;;  %vm80_vm1 = vcmask 171008   ;;  %s4116_s28 = smov 120   ;;  %vm126_vm2 = vcmask 1043456   ;;  %vm159_vm3 = vcmask 1041408   ;;  %s5145_s0 = inlined_call_operand.vmem [shape: f32[2,46,16], index: 0, kind: input, shape index: {}]   ;;  %s5146_s1 = inlined_call_operand.vmem [shape: f32[10,506], index: 1, kind: input, shape index: {}]   ;;  %s5147_s3 = inlined_call_operand.vmem [shape: f32[5,10,1], index: 3, kind: input, shape index: {}]   ;;  %s5148_s2 = inlined_call_operand.vmem [shape: f32[4,10,110], index: 2, kind: input, shape index: {}]   ;;  %s5149_s4 = inlined_call_operand.vmem [shape: f32[2,9,16], index: 4, kind: output, shape index: {}]  }
   0x1   :  { %v44_v0 = vld [vmem:[%s5145_s0 + $0x8] sm:$0xff]  ;;  %v45_v1 = vld [vmem:[%s5145_s0 + $0x10] sm:$0xff]  ;;  %v43_v2 = vld [vmem:[%s5145_s0] sm:$0xff]  ;;  %s4117_s29 = smov 124   ;;  %s4118_s30 = smov 122   ;;  %vm93_vm4 = vcmask 1045504  }
   0x2   :  { %v3373_v3 = vpack.i.bf16 %v45_v1, %v44_v0  ;;  %v47_v4 = vld [vmem:[%s5145_s0 + $0x20] sm:$0xff]  ;;  %v46_v5 = vld [vmem:[%s5145_s0 + $0x18] sm:$0xff]  ;;  %v48_v6 = vld [vmem:[%s5145_s0 + $0x28] sm:$0x3f]  ;;  %s4119_s5 = smov 126   ;;  %s4120_s6 = smov 123  }
   0x3   :  { %v3363_v7 = vpack.i.bf16 %v47_v4, %v43_v2  ;;  %v3368_v8 = vpack.i.bf16 %v46_v5, %v48_v6  ;;  %s4121_s7 = smov 125   ;;  %s4122_s8 = smov 119   ;;  %vm344_vm5 = vcmask 998400   ;;  %vm4332_vm6 = vmpackc.low %vm80_vm1, %vm80_vm1  ;;  %vm4127_vm7 = vmmov 1  }
   0x4   :  { %3374 = vrot.lane.b32.xlu1 %v3373_v3, %s4115_s27  ;;  %s4123_s9 = smov 127   ;;  %s4124_s10 = smov 118   ;;  %vm4354_vm8 = vmpackc.low %vm4127_vm7, %vm80_vm1  ;;  %vm605_vm10 = vcmask 900096   ;;  %vm1248_vm12 = vcmask 122880   ;;  %vm1246_vm13 = vcmask 130048  }
   0x5   :  { %3364 = vrot.lane.b32.xlu0 %v3363_v7, %s4115_s27  ;;  %s4125_s11 = smov 121   ;;  %vm4374_vm9 = vmpackc.low %vm159_vm3, %vm4127_vm7 }
   0x6   :  { %vm4448_vm11 = vmpackc.low %vm93_vm4, %vm4127_vm7 }
   0x9   :  { %3369 = vrot.lane.b32.xlu0 %v3368_v8, %s4115_s27 }
  0x76   :  { %v3375_v9 = vpop.permute.xlu1 %3374 }
  0x77   :  { %v3377_v10 = vunpack.i.h.bf16 %v3375_v9  ;;  %v3365_v11 = vpop.permute.xlu0 %3364  ;;  %v3376_v13 = vunpack.i.l.bf16 %v3375_v9 }
  0x78   :  { %v3367_v12 = vunpack.i.h.bf16 %v3365_v11  ;;  %v3366_v14 = vunpack.i.l.bf16 %v3365_v11 }
  0x79   :  { %v4175_v15 = vsel %vm73_vm0, 0.0, %v3377_v10  ;;  %v4181_v20 = vsel %vm73_vm0, 0.0, %v3376_v13 }
  0x7a   :  { %v4178_v17 = vsel %vm73_vm0, 0.0, %v3367_v12  ;;  %v4185_v21 = vsel %vm80_vm1, %v4175_v15, 0.0  ;;  %v4188_v22 = vsel %vm73_vm0, 0.0, %v3366_v14  ;;  %v4213_v31 = vsel %vm80_vm1, %v4181_v20, 0.0 }
  0x7b   :  { %v3370_v16 = vpop.permute.xlu0 %3369  ;;  %v4196_v25 = vsel %vm80_vm1, %v4178_v17, 0.0  ;;  %v81_v32 = vsel %vm80_vm1, %v4188_v22, 0.0  ;;  %v163_v37 = vrot.slane %v4185_v21, 6  ;;  %v161_v39 = vrot.slane %v4213_v31, 6 }
  0x7c   :  { %v3372_v18 = vunpack.i.h.bf16 %v3370_v16  ;;  %v3371_v19 = vunpack.i.l.bf16 %v3370_v16  ;;  %v4222_v34 = vpack.i.bf16 %v4213_v31, %v81_v32  ;;  %v134_v36 = vrot.slane %v4196_v25, 4 }
  0x7d   :  { %v160_v40 = vrot.slane %v81_v32, 6  ;;  %v94_v43 = vrot.slane %v81_v32, 2  ;;  %v164_v44 = vsel %vm159_vm3, %v161_v39, %v163_v37  ;;  %v95_v48 = vrot.slane %v4213_v31, 2 }
  0x7e   :  { %v4191_v23 = vsel %vm73_vm0, 0.0, %v3372_v18  ;;  %v79_v24 = vsel %vm73_vm0, 0.0, %v3371_v19  ;;  %v2960_v51 = vpack.c.bf16 %v4181_v20, %v4188_v22  ;;  %v101_v52 = vrot.slane %v4196_v25, 2 }
  0x7f   :  { %v4200_v26 = vsel %vm80_vm1, %v4191_v23, 0.0  ;;  %v2965_v27 = vpack.c.bf16 %v4191_v23, %v4175_v15  ;;  %v4205_v28 = vsel %vm80_vm1, %v79_v24, 0.0  ;;  %v162_v47 = vsel %vm159_vm3, %v160_v40, %v161_v39  ;;  %v20_v24 = vld [vmem:[%s5146_s1 + $0x18] sm:$0xff] }
  0x80   :  { %v3378_v29 = vpack.i.bf16 %v4200_v26, %v4185_v21  ;;  %v3383_v30 = vpack.i.bf16 %v4196_v25, %v4205_v28  ;;  %v3398_v33 = vpack.i.bf16 %v4205_v28, %v4196_v25  ;;  %v4225_v35 = vrot.slane %v4205_v28, 4  ;;  %2380 = vmatprep.mubr.msk.f32.mxu1 %vm344_vm5, %v20_v24 }
  0x81   :  { %v103_v38 = vrot.slane %v4205_v28, 2  ;;  %v165_v42 = vrot.slane %v4200_v26, 6  ;;  %v99_v50 = vrot.slane %v4200_v26, 2  ;;  %v3413_v54 = vpack.i.bf16 %v162_v47, %v160_v40 }
  0x82   :  { %3379 = vrot.lane.b32.xlu1 %v3378_v29, %s4116_s28  ;;  %3384 = vrot.lane.b32.xlu0 %v3383_v30, %s4116_s28  ;;  %v4238_v41 = vsel %vm126_vm2, %v134_v36, %v4225_v35  ;;  %v127_v55 = vrot.slane %v81_v32, 4  ;;  %v96_v58 = vsel %vm93_vm4, %v94_v43, %v95_v48  ;;  %v128_v59 = vrot.slane %v4213_v31, 4 }
  0x83   :  { %v3408_v45 = vpack.i.bf16 %v4238_v41, %v4225_v35  ;;  %v3403_v46 = vpack.i.bf16 %v94_v43, %v103_v38  ;;  %v166_v49 = vsel %vm159_vm3, %v163_v37, %v165_v42  ;;  %v102_v56 = vsel %vm93_vm4, %v99_v50, %v101_v52 }
  0x84   :  { %v3423_v53 = vpack.i.bf16 %v166_v49, %v164_v44  ;;  %v104_v57 = vsel %vm93_vm4, %v101_v52, %v103_v38  ;;  %v3428_v61 = vpack.i.bf16 %v96_v58, %v94_v43  ;;  %v129_v62 = vsel %vm126_vm2, %v127_v55, %v128_v59 }
  0x85   :  { %v3418_v60 = vpack.i.bf16 %v104_v57, %v102_v56  ;;  %v169_v63 = vrot.slane %v4205_v28, 6  ;;  %v97_v0 = vrot.slane %v4185_v21, 2  ;;  %v167_v1 = vrot.slane %v4196_v25, 6 }
  0x86   :  { %3399 = vrot.lane.b32.xlu1 %v3398_v33, %s4117_s29  ;;  %3389 = vrot.lane.b32.xlu0 %v4222_v34, %s4117_s29  ;;  %v3433_v2 = vpack.i.bf16 %v129_v62, %v127_v55  ;;  %v130_v3 = vrot.slane %v4185_v21, 4  ;;  %v132_v7 = vrot.slane %v4200_v26, 4  ;;  %v3463_v13 = vpack.i.bf16 %v103_v38, %v102_v56  ;;  %v18_v21 = vld [vmem:[%s5146_s1 + $0x8] sm:$0xff]  ;;  %v33_v26 = vld [vmem:[%s5147_s3] sm:$0xff] }
  0x87   :  { %v100_v4 = vsel %vm93_vm4, %v97_v0, %v99_v50  ;;  %v168_v5 = vsel %vm159_vm3, %v165_v42, %v167_v1  ;;  %v170_v6 = vsel %vm159_vm3, %v167_v1, %v169_v63  ;;  %v98_v8 = vsel %vm93_vm4, %v95_v48, %v97_v0  ;;  %417 = vmatprep.mubr.f32.mxu0 %v18_v21 }
  0x88   :  { %v3448_v9 = vpack.i.bf16 %v100_v4, %v98_v8  ;;  %v3443_v10 = vpack.i.bf16 %v170_v6, %v168_v5  ;;  %v131_v11 = vsel %vm126_vm2, %v128_v59, %v130_v3  ;;  %v133_v12 = vsel %vm126_vm2, %v130_v3, %v132_v7 }
  0x89   :  { %v3453_v14 = vpack.i.bf16 %v133_v12, %v131_v11  ;;  %v135_v16 = vsel %vm126_vm2, %v132_v7, %v134_v36  ;;  %v3503_v19 = vpack.i.bf16 %v98_v8, %v96_v58  ;;  %v4126_v25 = vmov 0  }
  0x8a   :  { %240 = vrot.lane.b32.xlu1 %v4225_v35, %s4118_s30  ;;  %3394 = vrot.lane.b32.xlu0 %v3378_v29, %s4117_s29  ;;  %v3468_v18 = vpack.i.bf16 %v4238_v41, %v135_v16  ;;  %v34_v29 = vld [vmem:[%s5147_s3 + $0x8] sm:$0x3] }
  0x8b   :  { %3528 = vset.pattern.permute.xlu1 %v4126_v25  ;;  %3529 = vset.pattern.permute.xlu0 %v4126_v25 }
  0x8e   :  { %3409 = vrot.lane.b32.xlu1 %v3408_v45, %s4119_s5  ;;  %3404 = vrot.lane.b32.xlu0 %v3403_v46, %s4120_s6 }
  0x92   :  { %3424 = vrot.lane.b32.xlu1 %v3423_v53, %s4121_s7  ;;  %3414 = vrot.lane.b32.xlu0 %v3413_v54, %s4121_s7 }
  0x96   :  { %3419 = vrot.lane.b32.xlu0 %v3418_v60, %s4120_s6  ;;  %3429 = vrot.lane.b32.xlu1 %v3428_v61, %s4122_s8 }
  0x9a   :  { %3439 = vrot.lane.b32.xlu0 %v3428_v61, %s4123_s9  ;;  %3434 = vrot.lane.b32.xlu1 %v3433_v2, %s4118_s30 }
  0x9e   :  { %3449 = vrot.lane.b32.xlu0 %v3448_v9, %s4122_s8  ;;  %3444 = vrot.lane.b32.xlu1 %v3443_v10, %s4121_s7 }
  0xa2   :  { %3464 = vrot.lane.b32.xlu0 %v3463_v13, %s4122_s8  ;;  %3454 = vrot.lane.b32.xlu1 %v3453_v14, %s4118_s30 }
  0xa6   :  { %3479 = vrot.lane.b32.xlu0 %v3433_v2, %s4124_s10  ;;  %3459 = vrot.lane.b32.xlu1 %v3448_v9, %s4123_s9 }
  0xaa   :  { %3484 = vrot.lane.b32.xlu0 %v3413_v54, %s4125_s11  ;;  %3469 = vrot.lane.b32.xlu1 %v3468_v18, %s4118_s30 }
  0xae   :  { %3489 = vrot.lane.b32.xlu0 %v3433_v2, %s4119_s5  ;;  %3474 = vrot.lane.b32.xlu1 %v3463_v13, %s4123_s9 }
  0xb2   :  { %115 = vrot.lane.b32.xlu0 %v104_v57, %s4123_s9  ;;  %295 = vrot.lane.b32.xlu1 %v104_v57, %s4122_s8 }
  0xb6   :  { %3499 = vrot.lane.b32.xlu0 %v3423_v53, %s4125_s11  ;;  %3494 = vrot.lane.b32.xlu1 %v3453_v14, %s4124_s10 }
  0xba   :  { %3509 = vrot.lane.b32.xlu0 %v3453_v14, %s4119_s5  ;;  %3504 = vrot.lane.b32.xlu1 %v3503_v19, %s4120_s6 }
  0xbe   :  { %3519 = vrot.lane.b32.xlu0 %v3443_v10, %s4125_s11  ;;  %3514 = vrot.lane.b32.xlu1 %v3468_v18, %s4124_s10 }
  0xc2   :  { %146 = vrot.lane.b32.xlu0 %v135_v16, %s4119_s5  ;;  %213 = vrot.lane.b32.xlu1 %v100_v4, %s4120_s6 }
  0xc6   :  { %3524 = vrot.lane.b32.xlu0 %v4222_v34, %s4116_s28  ;;  %318 = vrot.lane.b32.xlu1 %v4225_v35, %s4124_s10 }
  0xca   :  { %336 = vperm.xlu1 %3528, %v33_v26   ;;  %341 = vperm.xlu0 %3529, %v34_v29  }
  0xf4   :  { %v3380_v30 = vpop.permute.xlu1 %3379  ;;  %v3385_v31 = vpop.permute.xlu0 %3384 }
  0xf5   :  { %v3382_v32 = vunpack.i.h.bf16 %v3380_v30  ;;  %v3381_v33 = vunpack.i.l.bf16 %v3380_v30  ;;  %v3386_v54 = vunpack.i.l.bf16 %v3385_v31  ;;  %v3387_v58 = vunpack.i.h.bf16 %v3385_v31 }
  0xf7   :  { %v2993_v36 = vpack.c.bf16 %v3382_v32, %v3381_v33 }
  0xf8   :  { %v4319_v37 = vpop.permute.xlu1 %3399  ;;  %v4321_v34 = vpop.permute.xlu0 %3389 }
  0xf9   :  { %2994 = vmatprep.subr.bf16.mxu1 %v2993_v36  ;;  %v3391_v12 = vunpack.i.l.bf16 %v4321_v34 }
  0xfc   :  { %v4323_v35 = vpop.permute.xlu1 %240  ;;  %v4325_v38 = vpop.permute.xlu0 %3394 }
  0xfd   :  { %v3396_v29 = vunpack.i.l.bf16 %v4325_v38 }
 0x100   :  { %v3410_v39 = vpop.permute.xlu1 %3409  ;;  %v4327_v40 = vpop.permute.xlu0 %3404 }
 0x101   :  { %v3411_v43 = vunpack.i.l.bf16 %v3410_v39  ;;  %v3412_v47 = vunpack.i.h.bf16 %v3410_v39  ;;  %v3406_v1 = vunpack.i.l.bf16 %v4327_v40 }
 0x104   :  { %v3425_v41 = vpop.permute.xlu1 %3424  ;;  %v3415_v42 = vpop.permute.xlu0 %3414 }
 0x105   :  { %v3416_v44 = vunpack.i.l.bf16 %v3415_v42  ;;  %v3426_v45 = vunpack.i.l.bf16 %v3425_v41  ;;  %v3417_v46 = vunpack.i.h.bf16 %v3415_v42  ;;  %v3427_v22 = vunpack.i.h.bf16 %v3425_v41 }
 0x107   :  { %v328_v48 = vsel %vm159_vm3, %v3411_v43, %v3416_v44  ;;  %v2963_v59 = vpack.c.bf16 %v3426_v45, %v3417_v46 }
 0x108   :  { %v3420_v49 = vpop.permute.xlu0 %3419  ;;  %v3430_v50 = vpop.permute.xlu1 %3429  ;;  %v2958_v52 = vpack.c.bf16 %v328_v48, %v3412_v47  ;;  %v3397_v47 = vunpack.i.h.bf16 %v4325_v38 }
 0x109   :  { %v3431_v55 = vunpack.i.l.bf16 %v3430_v50  ;;  %v3422_v56 = vunpack.i.h.bf16 %v3420_v49  ;;  %v3421_v57 = vunpack.i.l.bf16 %v3420_v49 }
 0x10a   :  { %2959 = vmatprep.subr.bf16.mxu0 %v2958_v52 }
 0x10b   :  { %2962 = vmatpush3.bf16.msk.msra.mxu0 %vm4332_vm6, %v2960_v51  ;;  %v2995_v60 = vpack.c.bf16 %v3422_v56, %v3421_v57  ;;  %v332_v61 = vsel %vm93_vm4, %v3386_v54, %v3431_v55  ;;  %v3432_v51 = vunpack.i.h.bf16 %v3430_v50  ;;  %v3401_v56 = vunpack.i.l.bf16 %v4319_v37 }
 0x10c   :  { %2964 = vmatprep.subr.bf16.mxu0 %v2963_v59  ;;  %v3440_v62 = vpop.permute.xlu0 %3439  ;;  %v3435_v63 = vpop.permute.xlu1 %3434  ;;  %v2997_v0 = vpack.c.bf16 %v332_v61, %v3387_v58 }
 0x10d   :  { %v3441_v2 = vunpack.i.l.bf16 %v3440_v62  ;;  %v3437_v3 = vunpack.i.h.bf16 %v3435_v63  ;;  %v3436_v4 = vunpack.i.l.bf16 %v3435_v63  ;;  %2996 = vmatpush3.bf16.msra.mxu1 %v2995_v60  ;;  %v3442_v32 = vunpack.i.h.bf16 %v3440_v62 }
 0x10e   :  { %2998 = vmatprep.subr.bf16.mxu1 %v2997_v0  ;;  %v2981_v0 = vpack.c.bf16 %v3401_v56, %v3397_v47 }
 0x10f   :  { %2967 = vmatpush3.bf16.msk.msra.mxu0 %vm4332_vm6, %v2965_v27  ;;  %v330_v20 = vsel %vm126_vm2, %v3406_v1, %v3436_v4  ;;  %v326_v8 = vsel %vm93_vm4, %v4205_v28, %v3441_v2 }
 0x110   :  { %v3450_v5 = vpop.permute.xlu0 %3449  ;;  %v3445_v6 = vpop.permute.xlu1 %3444  ;;  %v2999_v7 = vpack.c.bf16 %v3437_v3, %v330_v20  ;;  %v2970_v28 = vpack.c.bf16 %v326_v8, %v4178_v17  ;;  %v3392_v17 = vunpack.i.h.bf16 %v4321_v34 }
 0x111   :  { %v3451_v9 = vunpack.i.l.bf16 %v3450_v5  ;;  %v3447_v10 = vunpack.i.h.bf16 %v3445_v6  ;;  %v3446_v11 = vunpack.i.l.bf16 %v3445_v6  ;;  %v3452_v13 = vunpack.i.h.bf16 %v3450_v5 }
 0x112   :  { %3000 = vmatpush3.bf16.msra.mxu1 %v2999_v7  ;;  %v2977_v42 = vpack.c.bf16 %v3396_v29, %v3392_v17  ;;  %v3407_v6 = vunpack.i.h.bf16 %v4327_v40 }
 0x113   :  { %v2968_v15 = vpack.c.bf16 %v3446_v11, %v3427_v22  ;;  %v3001_v23 = vpack.c.bf16 %v3451_v9, %v3432_v51  ;;  %v2973_v24 = vpack.c.bf16 %v3391_v12, %v3447_v10  ;;  %v3402_v9 = vunpack.i.h.bf16 %v4319_v37 }
 0x114   :  { %v3465_v14 = vpop.permute.xlu0 %3464  ;;  %v3455_v16 = vpop.permute.xlu1 %3454 }
 0x115   :  { %v3466_v18 = vunpack.i.l.bf16 %v3465_v14  ;;  %v3457_v19 = vunpack.i.h.bf16 %v3455_v16  ;;  %v3456_v21 = vunpack.i.l.bf16 %v3455_v16  ;;  %2969 = vmatprep.subr.bf16.mxu0 %v2968_v15  ;;  %3002 = vmatprep.subr.bf16.mxu1 %v3001_v23  ;;  %v3467_v57 = vunpack.i.h.bf16 %v3465_v14 }
 0x116   :  { %2972 = vmatpush3.bf16.msk.msra.mxu0 %vm4354_vm8, %v2970_v28 }
 0x117   :  { %2974 = vmatprep.subr.bf16.mxu0 %v2973_v24  ;;  %v3003_v25 = vpack.c.bf16 %v3457_v19, %v3456_v21  ;;  %v3005_v26 = vpack.c.bf16 %v3466_v18, %v3452_v13  ;;  %v329_v13 = vsel %vm93_vm4, %v3402_v9, %v3407_v6 }
 0x118   :  { %v3480_v30 = vpop.permute.xlu0 %3479  ;;  %v3460_v31 = vpop.permute.xlu1 %3459 }
 0x119   :  { %v3461_v33 = vunpack.i.l.bf16 %v3460_v31  ;;  %3004 = vmatpush3.bf16.msra.mxu1 %v3003_v25  ;;  %v3481_v48 = vunpack.i.l.bf16 %v3480_v30  ;;  %v3462_v52 = vunpack.i.h.bf16 %v3460_v31  ;;  %v3482_v22 = vunpack.i.h.bf16 %v3480_v30 }
 0x11a   :  { %3006 = vmatprep.subr.bf16.mxu1 %v3005_v26 }
 0x11b   :  { %v2975_v36 = vpack.c.bf16 %v3461_v33, %v3442_v32  ;;  %v333_v38 = vsel %vm126_vm2, %v3467_v57, %v3481_v48  ;;  %v21_v48 = vld [vmem:[%s5146_s1 + $0x20] sm:$0x3] }
 0x11c   :  { %v3485_v39 = vpop.permute.xlu0 %3484  ;;  %v3470_v41 = vpop.permute.xlu1 %3469 }
 0x11d   :  { %v3472_v43 = vunpack.i.h.bf16 %v3470_v41  ;;  %v3471_v44 = vunpack.i.l.bf16 %v3470_v41  ;;  %2976 = vmatpush3.bf16.msra.mxu0 %v2975_v36  ;;  %v3486_v45 = vunpack.i.l.bf16 %v3485_v39  ;;  %v3487_v58 = vunpack.i.h.bf16 %v3485_v39  ;;  %v4106_v41 = vld [vmem:[%s5146_s1 + $0x38] sm:$0x3] }
 0x11e   :  { %2978 = vmatprep.subr.bf16.mxu0 %v2977_v42  ;;  %v17_v42 = vld [vmem:[%s5146_s1] sm:$0xff] }
 0x11f   :  { %v3007_v46 = vpack.c.bf16 %v3472_v43, %v3471_v44  ;;  %v331_v60 = vsel %vm159_vm3, %v4323_v35, %v3486_v45 }
 0x120   :  { %v3490_v49 = vpop.permute.xlu0 %3489  ;;  %v3475_v50 = vpop.permute.xlu1 %3474  ;;  %v3011_v2 = vpack.c.bf16 %v3487_v58, %v331_v60 }
 0x121   :  { %v3491_v54 = vunpack.i.l.bf16 %v3490_v49  ;;  %v3477_v55 = vunpack.i.h.bf16 %v3475_v50  ;;  %v3476_v34 = vunpack.i.l.bf16 %v3475_v50  ;;  %3008 = vmatpush3.bf16.msra.mxu1 %v3007_v46  ;;  %v3492_v12 = vunpack.i.h.bf16 %v3490_v49  ;;  %v22_v46 = vld [vmem:[%s5146_s1 + $0x28] sm:$0x3]  ;;  %v19_v49 = vld [vmem:[%s5146_s1 + $0x10] sm:$0xff]  ;;  %v24_v50 = vld [vmem:[%s5146_s1 + $0x38] sm:$0x3] }
 0x123   :  { %v2979_v59 = vpack.c.bf16 %v3476_v34, %v3462_v52  ;;  %v327_v62 = vsel %vm126_vm2, %v3477_v55, %v3491_v54  ;;  %v23_v52 = vld [vmem:[%s5146_s1 + $0x30] sm:$0x3] }
 0x124   :  { %v116_v61 = vpop.permute.xlu0 %115  ;;  %v296_v63 = vpop.permute.xlu1 %295 }
 0x125   :  { %v3009_v1 = vpack.c.bf16 %v333_v38, %v296_v63  ;;  %2980 = vmatpush3.bf16.msra.mxu0 %v2979_v59  ;;  %v2983_v3 = vpack.c.bf16 %v327_v62, %v116_v61 }
 0x126   :  { %2982 = vmatprep.subr.bf16.mxu0 %v2981_v0 }
 0x127   :  { %3010 = vmatprep.subr.bf16.mxu1 %v3009_v1 }
 0x128   :  { %v3500_v4 = vpop.permute.xlu0 %3499  ;;  %v3495_v20 = vpop.permute.xlu1 %3494  ;;  %3012 = vmatpush3.bf16.msra.mxu1 %v3011_v2 }
 0x129   :  { %v3502_v51 = vunpack.i.h.bf16 %v3500_v4  ;;  %v3501_v5 = vunpack.i.l.bf16 %v3500_v4  ;;  %v3496_v35 = vunpack.i.l.bf16 %v3495_v20  ;;  %2984 = vmatpush3.bf16.msra.mxu0 %v2983_v3  ;;  %v3497_v19 = vunpack.i.h.bf16 %v3495_v20 }
 0x12b   :  { %v3013_v7 = vpack.c.bf16 %v3496_v35, %v3482_v22  ;;  %v3015_v8 = vpack.c.bf16 %v3502_v51, %v3501_v5 }
 0x12c   :  { %v3510_v10 = vpop.permute.xlu0 %3509  ;;  %v3505_v11 = vpop.permute.xlu1 %3504 }
 0x12d   :  { %v3511_v15 = vunpack.i.l.bf16 %v3510_v10  ;;  %v3506_v23 = vunpack.i.l.bf16 %v3505_v11  ;;  %3014 = vmatprep.subr.bf16.mxu1 %v3013_v7  ;;  %v3512_v37 = vunpack.i.h.bf16 %v3510_v10  ;;  %v3507_v25 = vunpack.i.h.bf16 %v3505_v11 }
 0x12e   :  { %3016 = vmatpush3.bf16.msra.mxu1 %v3015_v8 }
 0x12f   :  { %v2985_v14 = vpack.c.bf16 %v3506_v23, %v329_v13  ;;  %v2987_v16 = vpack.c.bf16 %v3511_v15, %v3492_v12 }
 0x130   :  { %v3520_v28 = vpop.permute.xlu0 %3519  ;;  %v3515_v18 = vpop.permute.xlu1 %3514 }
 0x131   :  { %v3522_v21 = vunpack.i.h.bf16 %v3520_v28  ;;  %v3521_v40 = vunpack.i.l.bf16 %v3520_v28  ;;  %v3516_v24 = vunpack.i.l.bf16 %v3515_v18  ;;  %2986 = vmatprep.subr.bf16.mxu0 %v2985_v14  ;;  %v3517_v17 = vunpack.i.h.bf16 %v3515_v18 }
 0x132   :  { %2988 = vmatpush3.bf16.msra.mxu0 %v2987_v16 }
 0x133   :  { %v3017_v26 = vpack.c.bf16 %v3516_v24, %v3497_v19  ;;  %v3019_v29 = vpack.c.bf16 %v3522_v21, %v3521_v40 }
 0x134   :  { %v147_v30 = vpop.permute.xlu0 %146  ;;  %v214_v31 = vpop.permute.xlu1 %213 }
 0x135   :  { %v2991_v32 = vpack.c.bf16 %v147_v30, %v3512_v37  ;;  %v2989_v33 = vpack.c.bf16 %v214_v31, %v3507_v25  ;;  %3018 = vmatprep.subr.bf16.mxu1 %v3017_v26  ;;  %v36_v37 = vld [vmem:[%s5147_s3 + $0x18] sm:$0x3]  ;;  %v35_v25 = vld [vmem:[%s5147_s3 + $0x10] sm:$0xff]  ;;  %v25_v26 = vld [vmem:[%s5148_s2] sm:$0xff] }
 0x136   :  { %3020 = vmatpush3.bf16.msra.mxu1 %v3019_v29 }
 0x137   :  { %2990 = vmatprep.subr.bf16.mxu0 %v2989_v33 }
 0x138   :  { %v3525_v36 = vpop.permute.xlu0 %3524  ;;  %v319_v39 = vpop.permute.xlu1 %318  ;;  %2992 = vmatpush3.bf16.msra.mxu0 %v2991_v32 }
 0x139   :  { %v3527_v43 = vunpack.i.h.bf16 %v3525_v36  ;;  %v3526_v44 = vunpack.i.l.bf16 %v3525_v36  ;;  %v3021_v45 = vpack.c.bf16 %v319_v39, %v3517_v17 }
 0x13b   :  { %3023 = vmatprep.subr.msk.bf16.mxu1 %vm4374_vm9, %v3021_v45  ;;  %418 = vmatmul.mubr.f32.vlgmr.msra.gmra.mrb[0].mxu0 %v17_v42  ;;  %v3024_v47 = vpack.c.bf16 %v3527_v43, %v3526_v44 }
 0x13c   :  { %422 = vmatprep.mubr.f32.mxu0 %v22_v46 }
 0x13d   :  { %3025 = vmatpush3.bf16.msra.mxu1 %v3024_v47 }
 0x13f   :  { %423 = vmatmul.mubr.f32.gmra.mrb[2].mxu0 %v21_v48 }
 0x140   :  { %493 = vmatmul.mubr.f32.vlgmr.msra.gmra.mrb[0].mxu1 %v19_v49  ;;  %2738 = vmatprep.mubr.msk.f32.mxu0 %vm605_vm10, %v25_v26 }
 0x141   :  { %2381 = vmatprep.mubr.msk.f32.mxu1 %vm344_vm5, %v24_v50 }
 0x144   :  { %498 = vmatmul.mubr.f32.gmra.mrb[2].mxu1 %v23_v52 }
 0x149   :  { %v4399_v56 = vpop.permute.xlu1 %336  ;;  %v4402_v38 = vpop.permute.xlu0 %341 }
 0x20e   :  { %v2462_v54 = vpop.f32.mrb[0].mxu0 }
 0x20f   :  { %v2463_v55 = vpop.f32.mrb[1].mxu0 }
 0x210   :  { %v2464_v34 = vadd.f32 %v2463_v55, %v2462_v54 }
 0x212   :  { %v2465_v57 = vpop.f32.mrb[2].mxu0  ;;  %v420_v58 = vadd.f32 %v2464_v34, %v4399_v56 }
 0x213   :  { %v2500_v59 = vpop.f32.mrb[0].mxu1  ;;  %v2466_v60 = vpop.f32.mrb[3].mxu0 }
 0x214   :  { %v2501_v61 = vpop.f32.mrb[1].mxu1  ;;  %v2467_v62 = vadd.f32 %v2466_v60, %v2465_v57 }
 0x215   :  { %v2502_v63 = vadd.f32 %v2501_v61, %v2500_v59 }
 0x216   :  { %v425_v1 = vadd.f32 %v2467_v62, %v4402_v38 }
 0x217   :  { %v495_v0 = vadd.f32 %v2502_v63, %v420_v58  ;;  %v2503_v2 = vpop.f32.mrb[2].mxu1 }
 0x218   :  { %v2504_v3 = vpop.f32.mrb[3].mxu1 }
 0x219   :  { %v503_v4 = vmax.f32 %v495_v0, 0.0  ;;  %v2505_v20 = vadd.f32 %v2504_v3, %v2503_v2 }
 0x21b   :  { %v500_v22 = vadd.f32 %v2505_v20, %v425_v1  ;;  %507 = vrot.lane.b32.xlu1 %v503_v4, %s4115_s27 }
 0x21d   :  { %v504_v51 = vmax.f32 %v500_v22, 0.0 }
 0x21f   :  { %509 = vrot.lane.b32.xlu1 %v504_v51, %s4115_s27 }
 0x28d   :  { %v508_v5 = vpop.permute.xlu1 %507 }
 0x28e   :  { %v513_v35 = vsel %vm73_vm0, 0.0, %v508_v5 }
 0x28f   :  { %v515_v6 = vsel %vm80_vm1, %v513_v35, 0.0 }
 0x290   :  { %v519_v9 = vrot.slane %v515_v6, 6  ;;  %v528_v11 = vrot.slane %v515_v6, 4  ;;  %v537_v16 = vrot.slane %v515_v6, 2 }
 0x291   :  { %v510_v7 = vpop.permute.xlu1 %509 }
 0x292   :  { %v514_v8 = vsel %vm73_vm0, 0.0, %v510_v7 }
 0x293   :  { %v516_v10 = vsel %vm80_vm1, %v514_v8, 0.0 }
 0x294   :  { %v529_v12 = vrot.slane %v516_v10, 4  ;;  %v520_v15 = vrot.slane %v516_v10, 6  ;;  %v538_v23 = vrot.slane %v516_v10, 2  ;;  %v3545_v21 = vpack.i.bf16 %v516_v10, %v515_v6 }
 0x295   :  { %v3560_v24 = vpack.i.bf16 %v515_v6, %v516_v10 }
 0x296   :  { %v530_v13 = vsel %vm126_vm2, %v528_v11, %v529_v12  ;;  %v521_v14 = vsel %vm159_vm3, %v519_v9, %v520_v15  ;;  %v539_v19 = vsel %vm93_vm4, %v537_v16, %v538_v23  ;;  %v26_v23 = vld [vmem:[%s5148_s2 + $0x8] sm:$0x3] }
 0x297   :  { %v3535_v28 = vpack.i.bf16 %v530_v13, %v528_v11  ;;  %v3530_v18 = vpack.i.bf16 %v521_v14, %v519_v9  ;;  %v3540_v40 = vpack.i.bf16 %v539_v19, %v537_v16 }
 0x299   :  { %3536 = vrot.lane.b32.xlu1 %v3535_v28, %s4119_s5  ;;  %3531 = vrot.lane.b32.xlu0 %v3530_v18, %s4123_s9 }
 0x29d   :  { %3546 = vrot.lane.b32.xlu1 %v3545_v21, %s4117_s29  ;;  %3541 = vrot.lane.b32.xlu0 %v3540_v40, %s4121_s7 }
 0x2a1   :  { %3556 = vrot.lane.b32.xlu1 %v3535_v28, %s4118_s30  ;;  %3551 = vrot.lane.b32.xlu0 %v3530_v18, %s4120_s6 }
 0x2a5   :  { %3561 = vrot.lane.b32.xlu1 %v3560_v24, %s4116_s28  ;;  %3566 = vrot.lane.b32.xlu0 %v3540_v40, %s4125_s11 }
 0x2a9   :  { %3576 = vrot.lane.b32.xlu1 %v3535_v28, %s4124_s10  ;;  %3571 = vrot.lane.b32.xlu0 %v3530_v18, %s4122_s8 }
 0x2ad   :  { %602 = vperm.xlu1 %3528, %v36_v37   ;;  %597 = vperm.xlu0 %3529, %v35_v25  }
 0x30b   :  { %v3537_v29 = vpop.permute.xlu1 %3536  ;;  %v3532_v30 = vpop.permute.xlu0 %3531 }
 0x30c   :  { %v3533_v31 = vunpack.i.l.bf16 %v3532_v30  ;;  %v3538_v32 = vunpack.i.l.bf16 %v3537_v29  ;;  %v3534_v33 = vunpack.i.h.bf16 %v3532_v30  ;;  %v3539_v43 = vunpack.i.h.bf16 %v3537_v29 }
 0x30e   :  { %v587_v17 = vsel %vm159_vm3, %v516_v10, %v3533_v31  ;;  %v588_v47 = vsel %vm126_vm2, %v3534_v33, %v3538_v32 }
 0x30f   :  { %v3547_v36 = vpop.permute.xlu1 %3546  ;;  %v3542_v39 = vpop.permute.xlu0 %3541  ;;  %v3026_v42 = vpack.c.bf16 %v587_v17, %v513_v35 }
 0x310   :  { %v3543_v44 = vunpack.i.l.bf16 %v3542_v39  ;;  %v3548_v45 = vunpack.i.l.bf16 %v3547_v36  ;;  %v3544_v46 = vunpack.i.h.bf16 %v3542_v39  ;;  %v3549_v54 = vunpack.i.h.bf16 %v3547_v36 }
 0x311   :  { %3028 = vmatprep.subr.msk.bf16.mxu0 %vm4354_vm8, %v3026_v42 }
 0x312   :  { %3031 = vmatpush3.bf16.msk.msra.mxu0 %vm4354_vm8, %v3026_v42  ;;  %v589_v48 = vsel %vm93_vm4, %v3539_v43, %v3543_v44  ;;  %v3036_v58 = vpack.c.bf16 %v3548_v45, %v3544_v46 }
 0x313   :  { %v3557_v49 = vpop.permute.xlu1 %3556  ;;  %v3552_v50 = vpop.permute.xlu0 %3551  ;;  %v3032_v52 = vpack.c.bf16 %v589_v48, %v588_v47 }
 0x314   :  { %v3558_v55 = vunpack.i.l.bf16 %v3557_v49  ;;  %v3554_v34 = vunpack.i.h.bf16 %v3552_v50  ;;  %v3553_v57 = vunpack.i.l.bf16 %v3552_v50  ;;  %v3559_v63 = vunpack.i.h.bf16 %v3557_v49  ;;  %v38_v50 = vld [vmem:[%s5147_s3 + $0x28] sm:$0x3] }
 0x315   :  { %3033 = vmatprep.subr.bf16.mxu0 %v3032_v52 }
 0x316   :  { %3035 = vmatpush3.bf16.msra.mxu0 %v3032_v52  ;;  %v590_v59 = vsel %vm159_vm3, %v3549_v54, %v3553_v57  ;;  %v591_v60 = vsel %vm126_vm2, %v3554_v34, %v3558_v55  ;;  %v37_v52 = vld [vmem:[%s5147_s3 + $0x20] sm:$0xff]  ;;  %v27_v54 = vld [vmem:[%s5148_s2 + $0x10] sm:$0xff] }
 0x317   :  { %v3562_v61 = vpop.permute.xlu1 %3561  ;;  %v3567_v62 = vpop.permute.xlu0 %3566  ;;  %3037 = vmatprep.subr.bf16.mxu0 %v3036_v58  ;;  %v3040_v2 = vpack.c.bf16 %v591_v60, %v590_v59  ;;  %2769 = vmatprep.mubr.msk.f32.mxu1 %vm605_vm10, %v27_v54 }
 0x318   :  { %v3568_v0 = vunpack.i.l.bf16 %v3567_v62  ;;  %v3569_v1 = vunpack.i.h.bf16 %v3567_v62  ;;  %v3563_v22 = vunpack.i.l.bf16 %v3562_v61  ;;  %v3564_v8 = vunpack.i.h.bf16 %v3562_v61 }
 0x31a   :  { %3039 = vmatpush3.bf16.msra.mxu0 %v3036_v58  ;;  %v592_v3 = vsel %vm93_vm4, %v3559_v63, %v3568_v0 }
 0x31b   :  { %v3577_v4 = vpop.permute.xlu1 %3576  ;;  %v3572_v20 = vpop.permute.xlu0 %3571  ;;  %3041 = vmatprep.subr.bf16.mxu0 %v3040_v2  ;;  %v3044_v5 = vpack.c.bf16 %v3569_v1, %v592_v3 }
 0x31c   :  { %v3573_v51 = vunpack.i.l.bf16 %v3572_v20  ;;  %v3578_v35 = vunpack.i.l.bf16 %v3577_v4  ;;  %v3574_v6 = vunpack.i.h.bf16 %v3572_v20  ;;  %v3579_v9 = vunpack.i.h.bf16 %v3577_v4 }
 0x31e   :  { %3043 = vmatpush3.bf16.msra.mxu0 %v3040_v2  ;;  %v593_v7 = vsel %vm159_vm3, %v3563_v22, %v3573_v51  ;;  %v594_v11 = vsel %vm126_vm2, %v3574_v6, %v3578_v35 }
 0x31f   :  { %3045 = vmatprep.subr.bf16.mxu0 %v3044_v5  ;;  %v3048_v10 = vpack.c.bf16 %v593_v7, %v3564_v8  ;;  %v3052_v15 = vpack.c.bf16 %v3579_v9, %v594_v11 }
 0x322   :  { %3047 = vmatpush3.bf16.msra.mxu0 %v3044_v5 }
 0x323   :  { %3049 = vmatprep.subr.bf16.mxu0 %v3048_v10 }
 0x326   :  { %3051 = vmatpush3.bf16.msra.mxu0 %v3048_v10 }
 0x327   :  { %3054 = vmatprep.subr.msk.bf16.mxu0 %vm4448_vm11, %v3052_v15 }
 0x32a   :  { %3057 = vmatpush3.bf16.msk.msra.mxu0 %vm4448_vm11, %v3052_v15 }
 0x32c   :  { %v4460_v13 = vpop.permute.xlu1 %602  ;;  %v4462_v16 = vpop.permute.xlu0 %597 }
 0x32d   :  { %2739 = vmatmul.mubr.msk.f32.vlgmr.msra.gmra.mrb[4].mxu0 %vm605_vm10, %v26_v23 }
 0x400   :  { %v2740_v14 = vpop.f32.mrb[4].mxu0 }
 0x401   :  { %v686_v28 = vadd.f32 %v2740_v14, %v4460_v13  ;;  %v680_v18 = vpop.f32.mrb[5].mxu0 }
 0x402   :  { %v681_v19 = vadd.f32 %v680_v18, %v4462_v16 }
 0x403   :  { %v690_v21 = vmax.f32 %v686_v28, 0.0 }
 0x404   :  { %v689_v40 = vmax.f32 %v681_v19, 0.0 }
 0x405   :  { %695 = vrot.lane.b32.xlu1 %v690_v21, %s4115_s27 }
 0x406   :  { %693 = vrot.lane.b32.xlu0 %v689_v40, %s4115_s27 }
 0x477   :  { %v696_v24 = vpop.permute.xlu1 %695 }
 0x478   :  { %v700_v37 = vsel %vm73_vm0, 0.0, %v696_v24  ;;  %v694_v25 = vpop.permute.xlu0 %693 }
 0x479   :  { %v702_v26 = vsel %vm80_vm1, %v700_v37, 0.0  ;;  %v699_v29 = vsel %vm73_vm0, 0.0, %v694_v25 }
 0x47a   :  { %v701_v30 = vsel %vm80_vm1, %v699_v29, 0.0  ;;  %v715_v31 = vrot.slane %v702_v26, 4  ;;  %v706_v32 = vrot.slane %v702_v26, 6  ;;  %v724_v39 = vrot.slane %v702_v26, 2 }
 0x47b   :  { %v705_v33 = vrot.slane %v701_v30, 6  ;;  %v714_v17 = vrot.slane %v701_v30, 4  ;;  %v723_v36 = vrot.slane %v701_v30, 2  ;;  %v3595_v47 = vpack.i.bf16 %v702_v26, %v701_v30 }
 0x47c   :  { %v3610_v49 = vpack.i.bf16 %v701_v30, %v702_v26 }
 0x47d   :  { %v716_v42 = vsel %vm126_vm2, %v714_v17, %v715_v31  ;;  %v707_v43 = vsel %vm159_vm3, %v705_v33, %v706_v32  ;;  %v725_v46 = vsel %vm93_vm4, %v723_v36, %v724_v39 }
 0x47e   :  { %v3585_v44 = vpack.i.bf16 %v716_v42, %v714_v17  ;;  %v3580_v45 = vpack.i.bf16 %v707_v43, %v705_v33  ;;  %v3590_v48 = vpack.i.bf16 %v725_v46, %v723_v36  ;;  %v28_v42 = vld [vmem:[%s5148_s2 + $0x18] sm:$0x3] }
 0x480   :  { %3586 = vrot.lane.b32.xlu1 %v3585_v44, %s4119_s5  ;;  %3581 = vrot.lane.b32.xlu0 %v3580_v45, %s4123_s9 }
 0x484   :  { %3596 = vrot.lane.b32.xlu1 %v3595_v47, %s4117_s29  ;;  %3591 = vrot.lane.b32.xlu0 %v3590_v48, %s4121_s7 }
 0x488   :  { %3606 = vrot.lane.b32.xlu1 %v3585_v44, %s4118_s30  ;;  %3601 = vrot.lane.b32.xlu0 %v3580_v45, %s4120_s6 }
 0x48c   :  { %3611 = vrot.lane.b32.xlu1 %v3610_v49, %s4116_s28  ;;  %3616 = vrot.lane.b32.xlu0 %v3590_v48, %s4125_s11 }
 0x490   :  { %3626 = vrot.lane.b32.xlu1 %v3585_v44, %s4124_s10  ;;  %3621 = vrot.lane.b32.xlu0 %v3580_v45, %s4122_s8 }
 0x494   :  { %788 = vperm.xlu1 %3528, %v38_v50   ;;  %783 = vperm.xlu0 %3529, %v37_v52  }
 0x4f2   :  { %v3587_v55 = vpop.permute.xlu1 %3586  ;;  %v3582_v34 = vpop.permute.xlu0 %3581 }
 0x4f3   :  { %v3583_v57 = vunpack.i.l.bf16 %v3582_v34  ;;  %v3588_v58 = vunpack.i.l.bf16 %v3587_v55  ;;  %v3584_v59 = vunpack.i.h.bf16 %v3582_v34  ;;  %v3589_v0 = vunpack.i.h.bf16 %v3587_v55 }
 0x4f5   :  { %v773_v60 = vsel %vm159_vm3, %v702_v26, %v3583_v57  ;;  %v774_v4 = vsel %vm126_vm2, %v3584_v59, %v3588_v58 }
 0x4f6   :  { %v3597_v61 = vpop.permute.xlu1 %3596  ;;  %v3592_v62 = vpop.permute.xlu0 %3591  ;;  %v3058_v63 = vpack.c.bf16 %v773_v60, %v699_v29 }
 0x4f7   :  { %v3593_v1 = vunpack.i.l.bf16 %v3592_v62  ;;  %v3598_v2 = vunpack.i.l.bf16 %v3597_v61  ;;  %v3594_v3 = vunpack.i.h.bf16 %v3592_v62  ;;  %v3599_v35 = vunpack.i.h.bf16 %v3597_v61 }
 0x4f8   :  { %3060 = vmatprep.subr.msk.bf16.mxu1 %vm4354_vm8, %v3058_v63 }
 0x4f9   :  { %3063 = vmatpush3.bf16.msk.msra.mxu1 %vm4354_vm8, %v3058_v63  ;;  %v775_v20 = vsel %vm93_vm4, %v3589_v0, %v3593_v1  ;;  %v3068_v9 = vpack.c.bf16 %v3598_v2, %v3594_v3 }
 0x4fa   :  { %v3607_v22 = vpop.permute.xlu1 %3606  ;;  %v3602_v51 = vpop.permute.xlu0 %3601  ;;  %v3064_v5 = vpack.c.bf16 %v775_v20, %v774_v4 }
 0x4fb   :  { %v3608_v6 = vunpack.i.l.bf16 %v3607_v22  ;;  %v3604_v7 = vunpack.i.h.bf16 %v3602_v51  ;;  %v3603_v8 = vunpack.i.l.bf16 %v3602_v51  ;;  %v3609_v14 = vunpack.i.h.bf16 %v3607_v22 }
 0x4fc   :  { %3065 = vmatprep.subr.bf16.mxu1 %v3064_v5 }
 0x4fd   :  { %3067 = vmatpush3.bf16.msra.mxu1 %v3064_v5  ;;  %v776_v10 = vsel %vm159_vm3, %v3599_v35, %v3603_v8  ;;  %v777_v11 = vsel %vm126_vm2, %v3604_v7, %v3608_v6  ;;  %v40_v35 = vld [vmem:[%s5147_s3 + $0x38] sm:$0x3]  ;;  %v39_v6 = vld [vmem:[%s5147_s3 + $0x30] sm:$0xff]  ;;  %v29_v7 = vld [vmem:[%s5148_s2 + $0x20] sm:$0xff] }
 0x4fe   :  { %v3612_v15 = vpop.permute.xlu1 %3611  ;;  %v3617_v23 = vpop.permute.xlu0 %3616  ;;  %3069 = vmatprep.subr.bf16.mxu1 %v3068_v9  ;;  %v3072_v19 = vpack.c.bf16 %v777_v11, %v776_v10  ;;  %2800 = vmatprep.mubr.msk.f32.mxu0 %vm605_vm10, %v29_v7 }
 0x4ff   :  { %v3618_v28 = vunpack.i.l.bf16 %v3617_v23  ;;  %v3619_v18 = vunpack.i.h.bf16 %v3617_v23  ;;  %v3613_v37 = vunpack.i.l.bf16 %v3612_v15  ;;  %v3614_v32 = vunpack.i.h.bf16 %v3612_v15 }
 0x501   :  { %3071 = vmatpush3.bf16.msra.mxu1 %v3068_v9  ;;  %v778_v21 = vsel %vm93_vm4, %v3609_v14, %v3618_v28 }
 0x502   :  { %v3627_v40 = vpop.permute.xlu1 %3626  ;;  %v3622_v24 = vpop.permute.xlu0 %3621  ;;  %3073 = vmatprep.subr.bf16.mxu1 %v3072_v19  ;;  %v3076_v26 = vpack.c.bf16 %v3619_v18, %v778_v21 }
 0x503   :  { %v3623_v25 = vunpack.i.l.bf16 %v3622_v24  ;;  %v3628_v29 = vunpack.i.l.bf16 %v3627_v40  ;;  %v3624_v30 = vunpack.i.h.bf16 %v3622_v24  ;;  %v3629_v33 = vunpack.i.h.bf16 %v3627_v40 }
 0x505   :  { %3075 = vmatpush3.bf16.msra.mxu1 %v3072_v19  ;;  %v779_v31 = vsel %vm159_vm3, %v3613_v37, %v3623_v25  ;;  %v780_v36 = vsel %vm126_vm2, %v3624_v30, %v3628_v29 }
 0x506   :  { %3077 = vmatprep.subr.bf16.mxu1 %v3076_v26  ;;  %v3080_v17 = vpack.c.bf16 %v779_v31, %v3614_v32  ;;  %v3084_v39 = vpack.c.bf16 %v3629_v33, %v780_v36 }
 0x509   :  { %3079 = vmatpush3.bf16.msra.mxu1 %v3076_v26 }
 0x50a   :  { %3081 = vmatprep.subr.bf16.mxu1 %v3080_v17 }
 0x50d   :  { %3083 = vmatpush3.bf16.msra.mxu1 %v3080_v17 }
 0x50e   :  { %3086 = vmatprep.subr.msk.bf16.mxu1 %vm4448_vm11, %v3084_v39 }
 0x511   :  { %3089 = vmatpush3.bf16.msk.msra.mxu1 %vm4448_vm11, %v3084_v39 }
 0x513   :  { %v4515_v43 = vpop.permute.xlu1 %788  ;;  %v4517_v45 = vpop.permute.xlu0 %783 }
 0x514   :  { %2770 = vmatmul.mubr.msk.f32.vlgmr.msra.gmra.mrb[4].mxu1 %vm605_vm10, %v28_v42 }
 0x5e7   :  { %v2771_v44 = vpop.f32.mrb[4].mxu1 }
 0x5e8   :  { %v871_v46 = vadd.f32 %v2771_v44, %v4515_v43  ;;  %v865_v47 = vpop.f32.mrb[5].mxu1 }
 0x5e9   :  { %v866_v48 = vadd.f32 %v865_v47, %v4517_v45 }
 0x5ea   :  { %v875_v49 = vmax.f32 %v871_v46, 0.0 }
 0x5eb   :  { %v874_v50 = vmax.f32 %v866_v48, 0.0 }
 0x5ec   :  { %880 = vrot.lane.b32.xlu1 %v875_v49, %s4115_s27 }
 0x5ed   :  { %878 = vrot.lane.b32.xlu0 %v874_v50, %s4115_s27 }
 0x65e   :  { %v881_v52 = vpop.permute.xlu1 %880 }
 0x65f   :  { %v885_v54 = vsel %vm73_vm0, 0.0, %v881_v52  ;;  %v879_v55 = vpop.permute.xlu0 %878 }
 0x660   :  { %v887_v34 = vsel %vm80_vm1, %v885_v54, 0.0  ;;  %v884_v57 = vsel %vm73_vm0, 0.0, %v879_v55 }
 0x661   :  { %v886_v58 = vsel %vm80_vm1, %v884_v57, 0.0  ;;  %v900_v59 = vrot.slane %v887_v34, 4  ;;  %v891_v60 = vrot.slane %v887_v34, 6  ;;  %v909_v0 = vrot.slane %v887_v34, 2 }
 0x662   :  { %v890_v61 = vrot.slane %v886_v58, 6  ;;  %v899_v62 = vrot.slane %v886_v58, 4  ;;  %v908_v63 = vrot.slane %v886_v58, 2  ;;  %v3645_v22 = vpack.i.bf16 %v887_v34, %v886_v58 }
 0x663   :  { %v3660_v5 = vpack.i.bf16 %v886_v58, %v887_v34 }
 0x664   :  { %v901_v1 = vsel %vm126_vm2, %v899_v62, %v900_v59  ;;  %v892_v2 = vsel %vm159_vm3, %v890_v61, %v891_v60  ;;  %v910_v20 = vsel %vm93_vm4, %v908_v63, %v909_v0 }
 0x665   :  { %v3635_v3 = vpack.i.bf16 %v901_v1, %v899_v62  ;;  %v3630_v4 = vpack.i.bf16 %v892_v2, %v890_v61  ;;  %v3640_v51 = vpack.i.bf16 %v910_v20, %v908_v63  ;;  %v2398_v20 = vld [vmem:[%s5145_s0 + $0x30] sm:$0xff] }
 0x667   :  { %3636 = vrot.lane.b32.xlu1 %v3635_v3, %s4119_s5  ;;  %3631 = vrot.lane.b32.xlu0 %v3630_v4, %s4123_s9 }
 0x66b   :  { %3646 = vrot.lane.b32.xlu1 %v3645_v22, %s4117_s29  ;;  %3641 = vrot.lane.b32.xlu0 %v3640_v51, %s4121_s7  ;;  %v2402_v22 = vld [vmem:[%s5145_s0 + $0x50] sm:$0xff] }
 0x66f   :  { %3656 = vrot.lane.b32.xlu1 %v3635_v3, %s4118_s30  ;;  %3651 = vrot.lane.b32.xlu0 %v3630_v4, %s4120_s6 }
 0x673   :  { %3661 = vrot.lane.b32.xlu1 %v3660_v5, %s4116_s28  ;;  %3666 = vrot.lane.b32.xlu0 %v3640_v51, %s4125_s11  ;;  %v2399_v51 = vld [vmem:[%s5145_s0 + $0x38] sm:$0xff]  ;;  %v3685_v5 = vpack.i.bf16 %v2402_v22, %v2398_v20 }
 0x677   :  { %3676 = vrot.lane.b32.xlu1 %v3635_v3, %s4124_s10  ;;  %3671 = vrot.lane.b32.xlu0 %v3630_v4, %s4122_s8  ;;  %v30_v3 = vld [vmem:[%s5148_s2 + $0x28] sm:$0x3] }
 0x678   :  { %v4100_v4 = vld [vmem:[%s5146_s1 + $0x8] sm:$0xff] }
 0x67b   :  { %973 = vperm.xlu1 %3528, %v40_v35   ;;  %968 = vperm.xlu0 %3529, %v39_v6   ;;  %v2400_v35 = vld [vmem:[%s5145_s0 + $0x40] sm:$0xff] }
 0x67c   :  { %v3695_v6 = vpack.i.bf16 %v2400_v35, %v2399_v51 }
 0x67f   :  { %3686 = vrot.lane.b32.xlu1 %v3685_v5, %s4115_s27 }
 0x683   :  { %3696 = vrot.lane.b32.xlu1 %v3695_v6, %s4115_s27 }
 0x6d9   :  { %v3637_v8 = vpop.permute.xlu1 %3636  ;;  %v3632_v9 = vpop.permute.xlu0 %3631 }
 0x6da   :  { %v3633_v10 = vunpack.i.l.bf16 %v3632_v9  ;;  %v3638_v11 = vunpack.i.l.bf16 %v3637_v8  ;;  %v3634_v15 = vunpack.i.h.bf16 %v3632_v9  ;;  %v3639_v19 = vunpack.i.h.bf16 %v3637_v8 }
 0x6dc   :  { %v958_v23 = vsel %vm159_vm3, %v887_v34, %v3633_v10  ;;  %v959_v37 = vsel %vm126_vm2, %v3634_v15, %v3638_v11 }
 0x6dd   :  { %v3647_v14 = vpop.permute.xlu1 %3646  ;;  %v3642_v28 = vpop.permute.xlu0 %3641  ;;  %v3090_v18 = vpack.c.bf16 %v958_v23, %v884_v57 }
 0x6de   :  { %v3643_v21 = vunpack.i.l.bf16 %v3642_v28  ;;  %v3648_v40 = vunpack.i.l.bf16 %v3647_v14  ;;  %v3644_v24 = vunpack.i.h.bf16 %v3642_v28  ;;  %v3649_v31 = vunpack.i.h.bf16 %v3647_v14 }
 0x6df   :  { %3092 = vmatprep.subr.msk.bf16.mxu0 %vm4354_vm8, %v3090_v18 }
 0x6e0   :  { %3095 = vmatpush3.bf16.msk.msra.mxu0 %vm4354_vm8, %v3090_v18  ;;  %v960_v25 = vsel %vm93_vm4, %v3639_v19, %v3643_v21  ;;  %v3100_v36 = vpack.c.bf16 %v3648_v40, %v3644_v24 }
 0x6e1   :  { %v3657_v26 = vpop.permute.xlu1 %3656  ;;  %v3652_v29 = vpop.permute.xlu0 %3651  ;;  %v3096_v30 = vpack.c.bf16 %v960_v25, %v959_v37 }
 0x6e2   :  { %v3658_v32 = vunpack.i.l.bf16 %v3657_v26  ;;  %v3654_v33 = vunpack.i.h.bf16 %v3652_v29  ;;  %v3653_v17 = vunpack.i.l.bf16 %v3652_v29  ;;  %v3659_v47 = vunpack.i.h.bf16 %v3657_v26 }
 0x6e3   :  { %3097 = vmatprep.subr.bf16.mxu0 %v3096_v30 }
 0x6e4   :  { %3099 = vmatpush3.bf16.msra.mxu0 %v3096_v30  ;;  %v961_v39 = vsel %vm159_vm3, %v3649_v31, %v3653_v17  ;;  %v962_v42 = vsel %vm126_vm2, %v3654_v33, %v3658_v32  ;;  %v2401_v31 = vld [vmem:[%s5145_s0 + $0x48] sm:$0xff]  ;;  %v2403_v32 = vld [vmem:[%s5145_s0 + $0x58] sm:$0x3f] }
 0x6e5   :  { %v3662_v44 = vpop.permute.xlu1 %3661  ;;  %v3667_v46 = vpop.permute.xlu0 %3666  ;;  %3101 = vmatprep.subr.bf16.mxu0 %v3100_v36  ;;  %v3104_v50 = vpack.c.bf16 %v962_v42, %v961_v39  ;;  %v3690_v39 = vpack.i.bf16 %v2401_v31, %v2403_v32 }
 0x6e6   :  { %v3668_v48 = vunpack.i.l.bf16 %v3667_v46  ;;  %v3669_v49 = vunpack.i.h.bf16 %v3667_v46  ;;  %v3663_v34 = vunpack.i.l.bf16 %v3662_v44  ;;  %v3664_v62 = vunpack.i.h.bf16 %v3662_v44 }
 0x6e8   :  { %3103 = vmatpush3.bf16.msra.mxu0 %v3100_v36  ;;  %v963_v52 = vsel %vm93_vm4, %v3659_v47, %v3668_v48 }
 0x6e9   :  { %v3677_v54 = vpop.permute.xlu1 %3676  ;;  %v3672_v55 = vpop.permute.xlu0 %3671  ;;  %3105 = vmatprep.subr.bf16.mxu0 %v3104_v50  ;;  %v3108_v58 = vpack.c.bf16 %v3669_v49, %v963_v52 }
 0x6ea   :  { %v3673_v57 = vunpack.i.l.bf16 %v3672_v55  ;;  %v3678_v59 = vunpack.i.l.bf16 %v3677_v54  ;;  %v3674_v60 = vunpack.i.h.bf16 %v3672_v55  ;;  %v3679_v63 = vunpack.i.h.bf16 %v3677_v54 }
 0x6ec   :  { %3107 = vmatpush3.bf16.msra.mxu0 %v3104_v50  ;;  %v964_v61 = vsel %vm159_vm3, %v3663_v34, %v3673_v57  ;;  %v965_v1 = vsel %vm126_vm2, %v3674_v60, %v3678_v59 }
 0x6ed   :  { %3109 = vmatprep.subr.bf16.mxu0 %v3108_v58  ;;  %v3112_v0 = vpack.c.bf16 %v964_v61, %v3664_v62  ;;  %v3116_v2 = vpack.c.bf16 %v3679_v63, %v965_v1 }
 0x6f0   :  { %3111 = vmatpush3.bf16.msra.mxu0 %v3108_v58 }
 0x6f1   :  { %3113 = vmatprep.subr.bf16.mxu0 %v3112_v0 }
 0x6f4   :  { %3115 = vmatpush3.bf16.msra.mxu0 %v3112_v0 }
 0x6f5   :  { %3118 = vmatprep.subr.msk.bf16.mxu0 %vm4448_vm11, %v3116_v2 }
 0x6f8   :  { %3121 = vmatpush3.bf16.msk.msra.mxu0 %vm4448_vm11, %v3116_v2 }
 0x6fa   :  { %v4587_v7 = vpop.permute.xlu1 %973  ;;  %v4592_v14 = vpop.permute.xlu0 %968 }
 0x6fb   :  { %2801 = vmatmul.mubr.msk.f32.vlgmr.msra.gmra.mrb[6].mxu0 %vm605_vm10, %v30_v3 }
 0x6fc   :  { %1603 = vmatprep.mubr.f32.mxu0 %v4100_v4 }
 0x6fe   :  { %v3687_v8 = vpop.permute.xlu1 %3686 }
 0x6ff   :  { %v3688_v9 = vunpack.i.l.bf16 %v3687_v8  ;;  %v3689_v61 = vunpack.i.h.bf16 %v3687_v8 }
 0x701   :  { %v4590_v10 = vsel %vm73_vm0, 0.0, %v3688_v9  ;;  %v4649_v63 = vsel %vm73_vm0, 0.0, %v3689_v61 }
 0x702   :  { %v3697_v11 = vpop.permute.xlu1 %3696  ;;  %v1287_v19 = vsel %vm80_vm1, %v4590_v10, 0.0  ;;  %v4653_v1 = vsel %vm80_vm1, %v4649_v63, 0.0 }
 0x703   :  { %v3698_v23 = vunpack.i.l.bf16 %v3697_v11  ;;  %v3699_v29 = vunpack.i.h.bf16 %v3697_v11  ;;  %v1363_v30 = vrot.slane %v1287_v19, 6  ;;  %v1299_v48 = vrot.slane %v1287_v19, 2 }
 0x704   :  { %v1331_v50 = vrot.slane %v1287_v19, 4  ;;  %v1338_v5 = vrot.slane %v4653_v1, 4  ;;  %v1306_v9 = vrot.slane %v4653_v1, 2 }
 0x705   :  { %v4599_v40 = vsel %vm73_vm0, 0.0, %v3698_v23  ;;  %v4617_v42 = vsel %vm73_vm0, 0.0, %v3699_v29 }
 0x706   :  { %v4603_v37 = vsel %vm80_vm1, %v4599_v40, 0.0  ;;  %v3156_v25 = vpack.c.bf16 %v4599_v40, %v4590_v10  ;;  %v4625_v46 = vsel %vm80_vm1, %v4617_v42, 0.0 }
 0x707   :  { %v1364_v33 = vrot.slane %v4603_v37, 6  ;;  %v1302_v47 = vrot.slane %v4625_v46, 2  ;;  %v1300_v49 = vrot.slane %v4603_v37, 2  ;;  %v1332_v52 = vrot.slane %v4603_v37, 4 }
 0x708   :  { %v4632_v54 = vpack.i.bf16 %v4603_v37, %v1287_v19  ;;  %v1366_v19 = vrot.slane %v4625_v46, 6 }
 0x709   :  { %v1365_v36 = vsel %vm159_vm3, %v1363_v30, %v1364_v33  ;;  %v4635_v55 = vsel %vm93_vm4, %v1299_v48, %v1300_v49  ;;  %v1333_v34 = vsel %vm126_vm2, %v1331_v50, %v1332_v52  ;;  %v4644_v59 = vsel %vm93_vm4, %v1300_v49, %v1302_v47 }
 0x70a   :  { %v4619_v44 = vpack.i.bf16 %v1365_v36, %v1363_v30  ;;  %v3730_v57 = vpack.i.bf16 %v4635_v55, %v1299_v48  ;;  %v4641_v58 = vpack.i.bf16 %v1333_v34, %v1331_v50  ;;  %v3875_v60 = vpack.i.bf16 %v4644_v59, %v4635_v55 }
 0x70b   :  { %v1367_v29 = vsel %vm159_vm3, %v1364_v33, %v1366_v19  ;;  %v1334_v34 = vrot.slane %v4625_v46, 4 }
 0x70c   :  { %3706 = vrot.lane.b32.xlu1 %v4619_v44, %s4121_s7 }
 0x7ce   :  { %v2802_v15 = vpop.f32.mrb[6].mxu0 }
 0x7cf   :  { %v1056_v28 = vadd.f32 %v2802_v15, %v4587_v7  ;;  %v1050_v18 = vpop.f32.mrb[7].mxu0 }
 0x7d0   :  { %v1051_v21 = vadd.f32 %v1050_v18, %v4592_v14 }
 0x7d1   :  { %v1060_v24 = vmax.f32 %v1056_v28, 0.0 }
 0x7d2   :  { %v1059_v26 = vmax.f32 %v1051_v21, 0.0 }
 0x7d4   :  { %v3680_v17 = vpack.i.bf16 %v1060_v24, %v1059_v26 }
 0x7d6   :  { %3681 = vrot.lane.b32.xlu0 %v3680_v17, %s4115_s27 }
 0x7da   :  { %3691 = vrot.lane.b32.xlu0 %v3690_v39, %s4115_s27 }
 0x848   :  { %v3682_v62 = vpop.permute.xlu0 %3681 }
 0x849   :  { %v3684_v17 = vunpack.i.h.bf16 %v3682_v62  ;;  %v3683_v36 = vunpack.i.l.bf16 %v3682_v62 }
 0x84b   :  { %v1070_v39 = vsel %vm73_vm0, 0.0, %v3684_v17  ;;  %v4716_v50 = vsel %vm73_vm0, 0.0, %v3683_v36 }
 0x84c   :  { %v3692_v0 = vpop.permute.xlu0 %3691  ;;  %v4723_v61 = vsel %vm80_vm1, %v1070_v39, 0.0  ;;  %v1071_v62 = vsel %vm80_vm1, %v4716_v50, 0.0 }
 0x84d   :  { %v3694_v2 = vunpack.i.h.bf16 %v3692_v0  ;;  %v3693_v3 = vunpack.i.l.bf16 %v3692_v0 }
 0x84f   :  { %v4656_v4 = vsel %vm73_vm0, 0.0, %v3694_v2  ;;  %v1286_v20 = vsel %vm73_vm0, 0.0, %v3693_v3 }
 0x850   :  { %v4661_v22 = vsel %vm80_vm1, %v4656_v4, 0.0  ;;  %v4664_v51 = vsel %vm80_vm1, %v1286_v20, 0.0  ;;  %v3765_v20 = vpack.i.bf16 %v4723_v61, %v1071_v62 }
 0x851   :  { %v4668_v35 = vrot.slane %v4664_v51, 2  ;;  %v4671_v6 = vrot.slane %v4664_v51, 4  ;;  %v1304_v8 = vrot.slane %v4661_v22, 2  ;;  %v1368_v21 = vrot.slane %v4661_v22, 6 }
 0x852   :  { %v3710_v24 = vpack.i.bf16 %v4661_v22, %v4625_v46  ;;  %v3725_v26 = vpack.i.bf16 %v4653_v1, %v4664_v51  ;;  %v1372_v49 = vrot.slane %v4664_v51, 6  ;;  %v1336_v0 = vrot.slane %v4661_v22, 4 }
 0x853   :  { %v4679_v11 = vsel %vm126_vm2, %v1338_v5, %v4671_v6  ;;  %v4682_v15 = vsel %vm93_vm4, %v1304_v8, %v1306_v9  ;;  %v4686_v23 = vsel %vm93_vm4, %v1306_v9, %v4668_v35  ;;  %v1369_v30 = vsel %vm159_vm3, %v1366_v19, %v1368_v21 }
 0x854   :  { %v3700_v28 = vpack.i.bf16 %v4679_v11, %v4671_v6  ;;  %v3715_v18 = vpack.i.bf16 %v4686_v23, %v4682_v15  ;;  %v4704_v31 = vpack.i.bf16 %v1369_v30, %v1367_v29  ;;  %v3735_v32 = vpack.i.bf16 %v1299_v48, %v4668_v35 }
 0x855   :  { %v4712_v33 = vsel %vm93_vm4, %v1302_v47, %v1304_v8  ;;  %v1370_v48 = vrot.slane %v4653_v1, 6  ;;  %v1075_v46 = vrot.slane %v1071_v62, 6  ;;  %v1335_v8 = vsel %vm126_vm2, %v1332_v52, %v1334_v34 }
 0x856   :  { %3701 = vrot.lane.b32.xlu0 %v3700_v28, %s4119_s5  ;;  %3716 = vrot.lane.b32.xlu1 %v3715_v18, %s4120_s6  ;;  %v3755_v47 = vpack.i.bf16 %v4712_v33, %v4644_v59  ;;  %v1084_v9 = vrot.slane %v1071_v62, 4  ;;  %v1337_v22 = vsel %vm126_vm2, %v1334_v34, %v1336_v0  ;;  %v1085_v28 = vrot.slane %v4723_v61, 4 }
 0x857   :  { %v1371_v2 = vsel %vm159_vm3, %v1368_v21, %v1370_v48  ;;  %v1373_v3 = vsel %vm159_vm3, %v1370_v48, %v1372_v49  ;;  %v1076_v18 = vrot.slane %v4723_v61, 6  ;;  %v3760_v19 = vpack.i.bf16 %v1337_v22, %v1335_v8 }
 0x858   :  { %v3770_v21 = vpack.i.bf16 %v1071_v62, %v4723_v61  ;;  %v1093_v29 = vrot.slane %v1071_v62, 2  ;;  %v1094_v52 = vrot.slane %v4723_v61, 2  ;;  %v3810_v39 = vpack.i.bf16 %v4668_v35, %v4682_v15  ;;  %v4772_v35 = vld [vmem:[%s5148_s2 + $0x30] sm:$0xff] }
 0x859   :  { %v1077_v37 = vsel %vm159_vm3, %v1075_v46, %v1076_v18  ;;  %v1339_v49 = vsel %vm126_vm2, %v1336_v0, %v1338_v5  ;;  %2831 = vmatprep.mubr.msk.f32.mxu1 %vm605_vm10, %v4772_v35  ;;  %v3860_v5 = vpack.i.bf16 %v4664_v51, %v4653_v1 }
 0x85a   :  { %3711 = vrot.lane.b32.xlu0 %v3710_v24, %s4116_s28  ;;  %3726 = vrot.lane.b32.xlu1 %v3725_v26, %s4116_s28  ;;  %v1086_v26 = vsel %vm126_vm2, %v1084_v9, %v1085_v28  ;;  %v1095_v17 = vsel %vm93_vm4, %v1093_v29, %v1094_v52  ;;  %v3825_v15 = vpack.i.bf16 %v4679_v11, %v1339_v49 }
 0x85b   :  { %v3780_v30 = vpack.i.bf16 %v1086_v26, %v1084_v9  ;;  %v3790_v36 = vpack.i.bf16 %v1095_v17, %v1093_v29 }
 0x85e   :  { %3721 = vrot.lane.b32.xlu0 %v4704_v31, %s4121_s7  ;;  %3736 = vrot.lane.b32.xlu1 %v3735_v32, %s4120_s6  ;;  %v3775_v32 = vpack.i.bf16 %v1077_v37, %v1075_v46 }
 0x862   :  { %3731 = vrot.lane.b32.xlu0 %v3730_v57, %s4122_s8  ;;  %3746 = vrot.lane.b32.xlu1 %v3730_v57, %s4123_s9  ;;  %v3750_v57 = vpack.i.bf16 %v1373_v3, %v1371_v2 }
 0x866   :  { %3741 = vrot.lane.b32.xlu0 %v4641_v58, %s4118_s30  ;;  %3756 = vrot.lane.b32.xlu1 %v3755_v47, %s4122_s8 }
 0x86a   :  { %3751 = vrot.lane.b32.xlu0 %v3750_v57, %s4121_s7  ;;  %3766 = vrot.lane.b32.xlu1 %v3765_v20, %s4117_s29 }
 0x86e   :  { %3761 = vrot.lane.b32.xlu0 %v3760_v19, %s4118_s30  ;;  %3771 = vrot.lane.b32.xlu1 %v3770_v21, %s4116_s28 }
 0x872   :  { %3781 = vrot.lane.b32.xlu1 %v3780_v30, %s4119_s5  ;;  %3776 = vrot.lane.b32.xlu0 %v3775_v32, %s4123_s9 }
 0x876   :  { %3786 = vrot.lane.b32.xlu1 %v4632_v54, %s4117_s29  ;;  %3791 = vrot.lane.b32.xlu0 %v3790_v36, %s4121_s7 }
 0x87a   :  { %3806 = vrot.lane.b32.xlu1 %v3780_v30, %s4118_s30  ;;  %3796 = vrot.lane.b32.xlu0 %v3755_v47, %s4123_s9  ;;  %v3161_v47 = vpack.c.bf16 %v4656_v4, %v4617_v42 }
 0x87e   :  { %3811 = vrot.lane.b32.xlu1 %v3810_v39, %s4122_s8  ;;  %3801 = vrot.lane.b32.xlu0 %v3775_v32, %s4120_s6 }
 0x882   :  { %3831 = vrot.lane.b32.xlu1 %v3710_v24, %s4117_s29  ;;  %3816 = vrot.lane.b32.xlu0 %v3790_v36, %s4125_s11 }
 0x886   :  { %3841 = vrot.lane.b32.xlu1 %v3780_v30, %s4124_s10  ;;  %3821 = vrot.lane.b32.xlu0 %v3775_v32, %s4122_s8 }
 0x88a   :  { %3846 = vrot.lane.b32.xlu1 %v4641_v58, %s4124_s10  ;;  %3826 = vrot.lane.b32.xlu0 %v3825_v15, %s4118_s30 }
 0x88e   :  { %3851 = vrot.lane.b32.xlu1 %v4619_v44, %s4125_s11  ;;  %3836 = vrot.lane.b32.xlu0 %v3810_v39, %s4123_s9  ;;  %v3707_v44 = vpop.permute.xlu1 %3706 }
 0x88f   :  { %v3708_v11 = vunpack.i.l.bf16 %v3707_v44 }
 0x892   :  { %3856 = vrot.lane.b32.xlu1 %v4641_v58, %s4119_s5  ;;  %1443 = vrot.lane.b32.xlu0 %v4671_v6, %s4118_s30 }
 0x896   :  { %1320 = vrot.lane.b32.xlu1 %v4686_v23, %s4123_s9  ;;  %1498 = vrot.lane.b32.xlu0 %v4686_v23, %s4122_s8 }
 0x89a   :  { %3871 = vrot.lane.b32.xlu1 %v4704_v31, %s4125_s11  ;;  %3861 = vrot.lane.b32.xlu0 %v3860_v5, %s4117_s29 }
 0x89e   :  { %3881 = vrot.lane.b32.xlu1 %v3760_v19, %s4119_s5  ;;  %3866 = vrot.lane.b32.xlu0 %v3760_v19, %s4124_s10 }
 0x8a2   :  { %3891 = vrot.lane.b32.xlu1 %v3750_v57, %s4125_s11  ;;  %3876 = vrot.lane.b32.xlu0 %v3875_v60, %s4120_s6 }
 0x8a6   :  { %1350 = vrot.lane.b32.xlu1 %v1339_v49, %s4119_s5  ;;  %3886 = vrot.lane.b32.xlu0 %v3825_v15, %s4124_s10 }
 0x8aa   :  { %3896 = vrot.lane.b32.xlu1 %v4632_v54, %s4116_s28  ;;  %1416 = vrot.lane.b32.xlu0 %v4712_v33, %s4120_s6  ;;  %v3709_v33 = vunpack.i.h.bf16 %v3707_v44 }
 0x8ae   :  { %1521 = vrot.lane.b32.xlu0 %v4671_v6, %s4124_s10 }
 0x8c8   :  { %v3702_v58 = vpop.permute.xlu0 %3701  ;;  %v4811_v1 = vpop.permute.xlu1 %3716 }
 0x8c9   :  { %v3704_v55 = vunpack.i.h.bf16 %v3702_v58  ;;  %v3703_v59 = vunpack.i.l.bf16 %v3702_v58 }
 0x8cb   :  { %v1531_v60 = vsel %vm159_vm3, %v3703_v59, %v3708_v11 }
 0x8cc   :  { %v3154_v23 = vpack.c.bf16 %v1531_v60, %v3704_v55  ;;  %v4814_v24 = vpop.permute.xlu0 %3711  ;;  %v4816_v31 = vpop.permute.xlu1 %3726 }
 0x8ce   :  { %3155 = vmatprep.subr.bf16.mxu0 %v3154_v23 }
 0x8cf   :  { %3158 = vmatpush3.bf16.msk.msra.mxu0 %vm4332_vm6, %v3156_v25 }
 0x8d0   :  { %v3722_v54 = vpop.permute.xlu0 %3721  ;;  %v4823_v6 = vpop.permute.xlu1 %3736 }
 0x8d1   :  { %v3723_v48 = vunpack.i.l.bf16 %v3722_v54  ;;  %v3724_v46 = vunpack.i.h.bf16 %v3722_v54 }
 0x8d3   :  { %v3159_v34 = vpack.c.bf16 %v3723_v48, %v3709_v33 }
 0x8d4   :  { %v4827_v62 = vpop.permute.xlu0 %3731  ;;  %v3747_v0 = vpop.permute.xlu1 %3746 }
 0x8d5   :  { %3160 = vmatprep.subr.bf16.mxu0 %v3159_v34  ;;  %v3748_v25 = vunpack.i.l.bf16 %v3747_v0  ;;  %v3749_v5 = vunpack.i.h.bf16 %v3747_v0 }
 0x8d6   :  { %3163 = vmatpush3.bf16.msk.msra.mxu0 %vm4332_vm6, %v3161_v47 }
 0x8d7   :  { %v1529_v57 = vsel %vm93_vm4, %v4664_v51, %v3748_v25 }
 0x8d8   :  { %v4831_v10 = vpop.permute.xlu0 %3741  ;;  %v4833_v40 = vpop.permute.xlu1 %3756  ;;  %v3166_v4 = vpack.c.bf16 %v1529_v57, %v4649_v63 }
 0x8dc   :  { %v3752_v2 = vpop.permute.xlu0 %3751  ;;  %v3767_v3 = vpop.permute.xlu1 %3766 }
 0x8dd   :  { %v3753_v20 = vunpack.i.l.bf16 %v3752_v2  ;;  %v3754_v37 = vunpack.i.h.bf16 %v3752_v2  ;;  %v3768_v39 = vunpack.i.l.bf16 %v3767_v3  ;;  %v3769_v60 = vunpack.i.h.bf16 %v3767_v3 }
 0x8df   :  { %v3164_v42 = vpack.c.bf16 %v3753_v20, %v3724_v46 }
 0x8e0   :  { %v4838_v8 = vpop.permute.xlu0 %3761  ;;  %v4840_v9 = vpop.permute.xlu1 %3771 }
 0x8e1   :  { %3165 = vmatprep.subr.bf16.mxu0 %v3164_v42 }
 0x8e2   :  { %3168 = vmatpush3.bf16.msk.msra.mxu0 %vm4354_vm8, %v3166_v4 }
 0x8e4   :  { %v3782_v53 = vpop.permute.xlu1 %3781  ;;  %v3777_v22 = vpop.permute.xlu0 %3776 }
 0x8e5   :  { %v3778_v28 = vunpack.i.l.bf16 %v3777_v22  ;;  %v3783_v18 = vunpack.i.l.bf16 %v3782_v53  ;;  %v3779_v19 = vunpack.i.h.bf16 %v3777_v22  ;;  %v3784_v29 = vunpack.i.h.bf16 %v3782_v53 }
 0x8e7   :  { %v1143_v51 = vsel %vm159_vm3, %v4723_v61, %v3778_v28  ;;  %v1144_v36 = vsel %vm126_vm2, %v3779_v19, %v3783_v18  ;;  %v3773_v18 = vunpack.i.l.bf16 %v4840_v9 }
 0x8e8   :  { %v3122_v21 = vpack.c.bf16 %v1143_v51, %v4716_v50  ;;  %v3787_v26 = vpop.permute.xlu1 %3786  ;;  %v3792_v63 = vpop.permute.xlu0 %3791 }
 0x8e9   :  { %v3788_v52 = vunpack.i.l.bf16 %v3787_v26  ;;  %v3793_v30 = vunpack.i.l.bf16 %v3792_v63  ;;  %v3794_v32 = vunpack.i.h.bf16 %v3792_v63  ;;  %v3789_v47 = vunpack.i.h.bf16 %v3787_v26 }
 0x8ea   :  { %3124 = vmatprep.subr.msk.bf16.mxu1 %vm4354_vm8, %v3122_v21  ;;  %v3774_v26 = vunpack.i.h.bf16 %v4840_v9  ;;  %v3733_v9 = vunpack.i.l.bf16 %v4827_v62 }
 0x8eb   :  { %v3169_v17 = vpack.c.bf16 %v3788_v52, %v3754_v37  ;;  %3127 = vmatpush3.bf16.msk.msra.mxu1 %vm4354_vm8, %v3122_v21  ;;  %v1145_v61 = vsel %vm93_vm4, %v3784_v29, %v3793_v30  ;;  %v3132_v58 = vpack.c.bf16 %v3768_v39, %v3794_v32  ;;  %v3719_v39 = vunpack.i.h.bf16 %v4811_v1 }
 0x8ec   :  { %v3807_v50 = vpop.permute.xlu1 %3806  ;;  %v4853_v49 = vpop.permute.xlu0 %3796  ;;  %v3128_v15 = vpack.c.bf16 %v1145_v61, %v1144_v36  ;;  %v3713_v36 = vunpack.i.l.bf16 %v4814_v24 }
 0x8ed   :  { %v3798_v44 = vunpack.i.l.bf16 %v4853_v49  ;;  %3170 = vmatprep.subr.bf16.mxu0 %v3169_v17  ;;  %v3808_v23 = vunpack.i.l.bf16 %v3807_v50  ;;  %v3809_v46 = vunpack.i.h.bf16 %v3807_v50  ;;  %v3714_v17 = vunpack.i.h.bf16 %v4814_v24 }
 0x8ee   :  { %3129 = vmatprep.subr.bf16.mxu1 %v3128_v15 }
 0x8ef   :  { %v3171_v11 = vpack.c.bf16 %v3798_v44, %v3749_v5  ;;  %3131 = vmatpush3.bf16.msra.mxu1 %v3128_v15  ;;  %v3718_v5 = vunpack.i.l.bf16 %v4811_v1  ;;  %v3728_v44 = vunpack.i.l.bf16 %v4816_v31  ;;  %v3729_v1 = vunpack.i.h.bf16 %v4816_v31  ;;  %v4101_v31 = vld [vmem:[%s5146_s1 + $0x18] sm:$0xff] }
 0x8f0   :  { %v4856_v55 = vpop.permute.xlu1 %3811  ;;  %v3802_v59 = vpop.permute.xlu0 %3801  ;;  %3133 = vmatprep.subr.bf16.mxu1 %v3132_v58 }
 0x8f1   :  { %v3804_v54 = vunpack.i.h.bf16 %v3802_v59  ;;  %v3803_v33 = vunpack.i.l.bf16 %v3802_v59  ;;  %3172 = vmatpush3.bf16.msra.mxu0 %v3171_v11  ;;  %v3189_v11 = vpack.c.bf16 %v3714_v17, %v3713_v36  ;;  %v3743_v59 = vunpack.i.l.bf16 %v4831_v10 }
 0x8f2   :  { %v3814_v36 = vunpack.i.h.bf16 %v4856_v55 }
 0x8f3   :  { %3135 = vmatpush3.bf16.msra.mxu1 %v3132_v58  ;;  %v1146_v48 = vsel %vm159_vm3, %v3769_v60, %v3803_v33  ;;  %v1147_v34 = vsel %vm126_vm2, %v3804_v54, %v3808_v23  ;;  %v3799_v58 = vunpack.i.h.bf16 %v4853_v49  ;;  %v32_v23 = vld [vmem:[%s5148_s2 + $0x38] sm:$0x3]  ;;  %v1535_v54 = vsel %vm93_vm4, %v3728_v44, %v3733_v9 }
 0x8f4   :  { %v4860_v0 = vpop.permute.xlu1 %3831  ;;  %v3817_v25 = vpop.permute.xlu0 %3816  ;;  %v3136_v2 = vpack.c.bf16 %v1147_v34, %v1146_v48  ;;  %v3738_v33 = vunpack.i.l.bf16 %v4823_v6  ;;  %v3191_v34 = vpack.c.bf16 %v3719_v39, %v3718_v5 }
 0x8f5   :  { %v3833_v57 = vunpack.i.l.bf16 %v4860_v0  ;;  %v3819_v20 = vunpack.i.h.bf16 %v3817_v25  ;;  %v3818_v42 = vunpack.i.l.bf16 %v3817_v25 }
 0x8f6   :  { %3137 = vmatprep.subr.bf16.mxu1 %v3136_v2  ;;  %v1533_v25 = vsel %vm126_vm2, %v3738_v33, %v3743_v59 }
 0x8f7   :  { %v3173_v3 = vpack.c.bf16 %v3833_v57, %v3789_v47  ;;  %v1148_v4 = vsel %vm93_vm4, %v3809_v46, %v3818_v42  ;;  %3139 = vmatpush3.bf16.msra.mxu1 %v3136_v2  ;;  %v3744_v47 = vunpack.i.h.bf16 %v4831_v10  ;;  %v3758_v2 = vunpack.i.l.bf16 %v4833_v40 }
 0x8f8   :  { %v3140_v53 = vpack.c.bf16 %v3819_v20, %v1148_v4  ;;  %v3842_v22 = vpop.permute.xlu1 %3841  ;;  %v3822_v28 = vpop.permute.xlu0 %3821  ;;  %v3193_v46 = vpack.c.bf16 %v1535_v54, %v3729_v1  ;;  %v3734_v57 = vunpack.i.h.bf16 %v4827_v62  ;;  %v3764_v20 = vunpack.i.h.bf16 %v4838_v8 }
 0x8f9   :  { %v3843_v19 = vunpack.i.l.bf16 %v3842_v22  ;;  %v3824_v51 = vunpack.i.h.bf16 %v3822_v28  ;;  %v3823_v21 = vunpack.i.l.bf16 %v3822_v28  ;;  %3174 = vmatprep.subr.bf16.mxu0 %v3173_v3  ;;  %v3844_v63 = vunpack.i.h.bf16 %v3842_v22 }
 0x8fa   :  { %3141 = vmatprep.subr.bf16.mxu1 %v3140_v53  ;;  %v3763_v10 = vunpack.i.l.bf16 %v4838_v8  ;;  %v3195_v4 = vpack.c.bf16 %v3744_v47, %v1533_v25  ;;  %v3197_v22 = vpack.c.bf16 %v3758_v2, %v3734_v57  ;;  %v3813_v28 = vunpack.i.l.bf16 %v4856_v55 }
 0x8fb   :  { %v1150_v37 = vsel %vm126_vm2, %v3824_v51, %v3843_v19  ;;  %3143 = vmatpush3.bf16.msra.mxu1 %v3140_v53  ;;  %v1149_v29 = vsel %vm159_vm3, %v3773_v18, %v3823_v21  ;;  %v3759_v19 = vunpack.i.h.bf16 %v4833_v40  ;;  %v3834_v62 = vunpack.i.h.bf16 %v4860_v0 }
 0x8fc   :  { %v4868_v52 = vpop.permute.xlu1 %3846  ;;  %v4870_v30 = vpop.permute.xlu0 %3826  ;;  %v3144_v32 = vpack.c.bf16 %v1149_v29, %v3774_v26  ;;  %v3148_v61 = vpack.c.bf16 %v3844_v63, %v1150_v37  ;;  %v3199_v51 = vpack.c.bf16 %v3764_v20, %v3763_v10  ;;  %v3739_v55 = vunpack.i.h.bf16 %v4823_v6 }
 0x8fd   :  { %v3848_v21 = vunpack.i.l.bf16 %v4868_v52  ;;  %v3829_v63 = vunpack.i.h.bf16 %v4870_v30  ;;  %v3828_v37 = vunpack.i.l.bf16 %v4870_v30  ;;  %v3201_v17 = vpack.c.bf16 %v3813_v28, %v3759_v19 }
 0x8fe   :  { %3145 = vmatprep.subr.bf16.mxu1 %v3144_v32  ;;  %v3849_v59 = vunpack.i.h.bf16 %v4868_v52 }
 0x8ff   :  { %3147 = vmatpush3.bf16.msra.mxu1 %v3144_v32  ;;  %v1536_v5 = vsel %vm126_vm2, %v3814_v36, %v3848_v21  ;;  %v4107_v36 = vld [vmem:[%s5148_s2] sm:$0xff] }
 0x900   :  { %v4876_v50 = vpop.permute.xlu1 %3851  ;;  %v3837_v15 = vpop.permute.xlu0 %3836  ;;  %3150 = vmatprep.subr.msk.bf16.mxu1 %vm4448_vm11, %v3148_v61 }
 0x901   :  { %v3838_v24 = vunpack.i.l.bf16 %v3837_v15  ;;  %v3839_v18 = vunpack.i.h.bf16 %v3837_v15  ;;  %v3853_v40 = vunpack.i.l.bf16 %v4876_v50  ;;  %v3203_v15 = vpack.c.bf16 %v3829_v63, %v3828_v37  ;;  %v4102_v37 = vld [vmem:[%s5146_s1] sm:$0xff] }
 0x903   :  { %v3175_v60 = vpack.c.bf16 %v3838_v24, %v3799_v58  ;;  %3153 = vmatpush3.bf16.msk.msra.mxu1 %vm4448_vm11, %v3148_v61 }
 0x904   :  { %v4892_v48 = vpop.permute.xlu1 %3856  ;;  %v1444_v49 = vpop.permute.xlu0 %1443  ;;  %3190 = vmatprep.subr.bf16.mxu1 %v3189_v11  ;;  %v3854_v11 = vunpack.i.h.bf16 %v4876_v50 }
 0x905   :  { %3176 = vmatpush3.bf16.msra.mxu0 %v3175_v60  ;;  %v3858_v53 = vunpack.i.l.bf16 %v4892_v48  ;;  %v1534_v30 = vsel %vm159_vm3, %v1444_v49, %v3853_v40  ;;  %v3859_v49 = vunpack.i.h.bf16 %v4892_v48  ;;  %v4109_v40 = vld [vmem:[%s5148_s2 + $0x10] sm:$0xff] }
 0x906   :  { %2832 = vmatmul.mubr.msk.f32.vlgmr.msra.gmra.mrb[6].mxu1 %vm605_vm10, %v32_v23 }
 0x907   :  { %3192 = vmatpush3.bf16.msra.mxu1 %v3191_v34  ;;  %2410 = vmatprep.mubr.msk.f32.mxu1 %vm344_vm5, %v4101_v31  ;;  %v1530_v29 = vsel %vm126_vm2, %v3839_v18, %v3858_v53  ;;  %v3207_v34 = vpack.c.bf16 %v3854_v11, %v1534_v30 }
 0x908   :  { %v1321_v42 = vpop.permute.xlu1 %1320  ;;  %v1499_v3 = vpop.permute.xlu0 %1498  ;;  %3194 = vmatprep.subr.bf16.mxu1 %v3193_v46 }
 0x909   :  { %v3179_v0 = vpack.c.bf16 %v1530_v29, %v1321_v42  ;;  %v3205_v44 = vpack.c.bf16 %v1536_v5, %v1499_v3  ;;  %v4103_v29 = vld [vmem:[%s5146_s1 + $0x28] sm:$0x3] }
 0x90b   :  { %3196 = vmatpush3.bf16.msra.mxu1 %v3195_v4 }
 0x90c   :  { %v3872_v26 = vpop.permute.xlu1 %3871  ;;  %v3862_v8 = vpop.permute.xlu0 %3861  ;;  %3198 = vmatprep.subr.bf16.mxu1 %v3197_v22 }
 0x90d   :  { %v3863_v32 = vunpack.i.l.bf16 %v3862_v8  ;;  %v3864_v58 = vunpack.i.h.bf16 %v3862_v8  ;;  %v3874_v60 = vunpack.i.h.bf16 %v3872_v26  ;;  %v3873_v23 = vunpack.i.l.bf16 %v3872_v26 }
 0x90f   :  { %v3177_v61 = vpack.c.bf16 %v3863_v32, %v3834_v62  ;;  %3200 = vmatpush3.bf16.msra.mxu1 %v3199_v51  ;;  %v1532_v2 = vsel %vm93_vm4, %v3864_v58, %v3739_v55  ;;  %v3211_v6 = vpack.c.bf16 %v3874_v60, %v3873_v23  ;;  %v4104_v32 = vld [vmem:[%s5146_s1 + $0x20] sm:$0x3] }
 0x910   :  { %v3882_v9 = vpop.permute.xlu1 %3881  ;;  %v3867_v39 = vpop.permute.xlu0 %3866  ;;  %3202 = vmatprep.subr.bf16.mxu1 %v3201_v17  ;;  %v4105_v17 = vld [vmem:[%s5146_s1 + $0x10] sm:$0xff] }
 0x911   :  { %3178 = vmatprep.subr.bf16.mxu0 %v3177_v61  ;;  %v3868_v24 = vunpack.i.l.bf16 %v3867_v39  ;;  %v3883_v54 = vunpack.i.l.bf16 %v3882_v9  ;;  %v3869_v52 = vunpack.i.h.bf16 %v3867_v39  ;;  %v3884_v48 = vunpack.i.h.bf16 %v3882_v9  ;;  %v4108_v61 = vld [vmem:[%s5146_s1 + $0x30] sm:$0x3] }
 0x912   :  { %3180 = vmatpush3.bf16.msra.mxu0 %v3179_v0 }
 0x913   :  { %3204 = vmatpush3.bf16.msra.mxu1 %v3203_v15  ;;  %v3209_v25 = vpack.c.bf16 %v3868_v24, %v3849_v59  ;;  %v3183_v50 = vpack.c.bf16 %v3883_v54, %v3859_v49 }
 0x914   :  { %v3892_v1 = vpop.permute.xlu1 %3891  ;;  %v3877_v33 = vpop.permute.xlu0 %3876  ;;  %3206 = vmatprep.subr.bf16.mxu1 %v3205_v44 }
 0x915   :  { %v3878_v47 = vunpack.i.l.bf16 %v3877_v33  ;;  %v3894_v20 = vunpack.i.h.bf16 %v3892_v1  ;;  %v3893_v10 = vunpack.i.l.bf16 %v3892_v1  ;;  %v3879_v3 = vunpack.i.h.bf16 %v3877_v33 }
 0x917   :  { %v3181_v46 = vpack.c.bf16 %v3878_v47, %v1532_v2  ;;  %3208 = vmatpush3.bf16.msra.mxu1 %v3207_v34  ;;  %v3215_v28 = vpack.c.bf16 %v3894_v20, %v3893_v10 }
 0x918   :  { %v1351_v31 = vpop.permute.xlu1 %1350  ;;  %v3887_v57 = vpop.permute.xlu0 %3886  ;;  %3210 = vmatprep.subr.bf16.mxu1 %v3209_v25 }
 0x919   :  { %v3888_v42 = vunpack.i.l.bf16 %v3887_v57  ;;  %3182 = vmatprep.subr.bf16.mxu0 %v3181_v46  ;;  %v3187_v19 = vpack.c.bf16 %v1351_v31, %v3884_v48  ;;  %v3889_v21 = vunpack.i.h.bf16 %v3887_v57 }
 0x91a   :  { %3184 = vmatpush3.bf16.msra.mxu0 %v3183_v50 }
 0x91b   :  { %v3213_v4 = vpack.c.bf16 %v3888_v42, %v3869_v52  ;;  %3212 = vmatpush3.bf16.msra.mxu1 %v3211_v6 }
 0x91c   :  { %v3897_v53 = vpop.permute.xlu1 %3896  ;;  %v1417_v22 = vpop.permute.xlu0 %1416 }
 0x91d   :  { %v3185_v18 = vpack.c.bf16 %v1417_v22, %v3879_v3  ;;  %3214 = vmatprep.subr.bf16.mxu1 %v3213_v4  ;;  %v3899_v51 = vunpack.i.h.bf16 %v3897_v53  ;;  %v3898_v62 = vunpack.i.l.bf16 %v3897_v53 }
 0x91f   :  { %3186 = vmatprep.subr.bf16.mxu0 %v3185_v18  ;;  %3216 = vmatpush3.bf16.msra.mxu1 %v3215_v28  ;;  %v3220_v63 = vpack.c.bf16 %v3899_v51, %v3898_v62 }
 0x920   :  { %v1522_v26 = vpop.permute.xlu0 %1521  ;;  %3188 = vmatpush3.bf16.msra.mxu0 %v3187_v19 }
 0x921   :  { %v3217_v8 = vpack.c.bf16 %v1522_v26, %v3889_v21 }
 0x923   :  { %1604 = vmatmul.mubr.f32.vlgmr.msra.gmra.mrb[8].mxu0 %v4102_v37  ;;  %3219 = vmatprep.subr.msk.bf16.mxu1 %vm4374_vm9, %v3217_v8 }
 0x924   :  { %3221 = vmatpush3.bf16.msra.mxu1 %v3220_v63  ;;  %1608 = vmatprep.mubr.f32.mxu0 %v4103_v29 }
 0x927   :  { %1609 = vmatmul.mubr.f32.gmra.mrb[10].mxu0 %v4104_v32  ;;  %1679 = vmatmul.mubr.f32.vlgmr.msra.gmra.mrb[8].mxu1 %v4105_v17 }
 0x928   :  { %2411 = vmatprep.mubr.msk.f32.mxu1 %vm344_vm5, %v4106_v41  ;;  %2862 = vmatprep.mubr.msk.f32.mxu0 %vm605_vm10, %v4107_v36 }
 0x92b   :  { %1684 = vmatmul.mubr.f32.gmra.mrb[10].mxu1 %v4108_v61 }
 0x92c   :  { %2893 = vmatprep.mubr.msk.f32.mxu1 %vm605_vm10, %v4109_v40 }
 0x9d9   :  { %v4951_v0 = vpop.f32.mrb[6].mxu1 }
 0x9da   :  { %v4953_v9 = vpop.f32.mrb[7].mxu1 }
 0x9f6   :  { %v2602_v39 = vpop.f32.mrb[8].mxu0 }
 0x9f7   :  { %v2603_v15 = vpop.f32.mrb[9].mxu0 }
 0x9f8   :  { %v2604_v5 = vadd.f32 %v2603_v15, %v2602_v39 }
 0x9fa   :  { %v2605_v30 = vpop.f32.mrb[10].mxu0  ;;  %v2640_v44 = vpop.f32.mrb[8].mxu1  ;;  %v1606_v55 = vadd.f32 %v2604_v5, %v4399_v56 }
 0x9fb   :  { %v2606_v58 = vpop.f32.mrb[11].mxu0  ;;  %v2641_v24 = vpop.f32.mrb[9].mxu1 }
 0x9fc   :  { %v2607_v11 = vadd.f32 %v2606_v58, %v2605_v30  ;;  %v2642_v59 = vadd.f32 %v2641_v24, %v2640_v44 }
 0x9fe   :  { %v1681_v60 = vadd.f32 %v2642_v59, %v1606_v55  ;;  %v2643_v23 = vpop.f32.mrb[10].mxu1  ;;  %v1611_v1 = vadd.f32 %v2607_v11, %v4402_v38 }
 0x9ff   :  { %v2644_v54 = vpop.f32.mrb[11].mxu1 }
 0xa00   :  { %v1689_v33 = vmax.f32 %v1681_v60, 0.0  ;;  %v2645_v34 = vadd.f32 %v2644_v54, %v2643_v23 }
 0xa02   :  { %v1686_v47 = vadd.f32 %v2645_v34, %v1611_v1  ;;  %1693 = vrot.lane.b32.xlu0 %v1689_v33, %s4115_s27 }
 0xa04   :  { %v1690_v49 = vmax.f32 %v1686_v47, 0.0 }
 0xa06   :  { %1695 = vrot.lane.b32.xlu1 %v1690_v49, %s4115_s27 }
 0xa74   :  { %v1694_v25 = vpop.permute.xlu0 %1693 }
 0xa75   :  { %v1699_v2 = vsel %vm73_vm0, 0.0, %v1694_v25 }
 0xa76   :  { %v1701_v56 = vsel %vm80_vm1, %v1699_v2, 0.0 }
 0xa77   :  { %v1705_v50 = vrot.slane %v1701_v56, 6  ;;  %v1714_v38 = vrot.slane %v1701_v56, 4  ;;  %v1723_v10 = vrot.slane %v1701_v56, 2 }
 0xa78   :  { %v1696_v46 = vpop.permute.xlu1 %1695 }
 0xa79   :  { %v1700_v6 = vsel %vm73_vm0, 0.0, %v1696_v46 }
 0xa7a   :  { %v1702_v31 = vsel %vm80_vm1, %v1700_v6, 0.0 }
 0xa7b   :  { %v1706_v57 = vrot.slane %v1702_v31, 6  ;;  %v1715_v52 = vrot.slane %v1702_v31, 4  ;;  %v1724_v20 = vrot.slane %v1702_v31, 2  ;;  %v3915_v22 = vpack.i.bf16 %v1702_v31, %v1701_v56 }
 0xa7c   :  { %v3930_v18 = vpack.i.bf16 %v1701_v56, %v1702_v31 }
 0xa7d   :  { %v1716_v42 = vsel %vm126_vm2, %v1714_v38, %v1715_v52  ;;  %v1707_v3 = vsel %vm159_vm3, %v1705_v50, %v1706_v57  ;;  %v1725_v53 = vsel %vm93_vm4, %v1723_v10, %v1724_v20 }
 0xa7e   :  { %v3905_v4 = vpack.i.bf16 %v1716_v42, %v1714_v38  ;;  %v3900_v48 = vpack.i.bf16 %v1707_v3, %v1705_v50  ;;  %v3910_v28 = vpack.i.bf16 %v1725_v53, %v1723_v10  ;;  %v4110_v42 = vld [vmem:[%s5148_s2 + $0x8] sm:$0x3]  ;;  %v4111_v3 = vld [vmem:[%s5148_s2 + $0x20] sm:$0xff] }
 0xa80   :  { %3906 = vrot.lane.b32.xlu1 %v3905_v4, %s4119_s5  ;;  %3901 = vrot.lane.b32.xlu0 %v3900_v48, %s4123_s9 }
 0xa84   :  { %3916 = vrot.lane.b32.xlu1 %v3915_v22, %s4117_s29  ;;  %3911 = vrot.lane.b32.xlu0 %v3910_v28, %s4121_s7 }
 0xa88   :  { %3926 = vrot.lane.b32.xlu1 %v3905_v4, %s4118_s30  ;;  %3921 = vrot.lane.b32.xlu0 %v3900_v48, %s4120_s6 }
 0xa8c   :  { %3931 = vrot.lane.b32.xlu1 %v3930_v18, %s4116_s28  ;;  %3936 = vrot.lane.b32.xlu0 %v3910_v28, %s4125_s11 }
 0xa90   :  { %3946 = vrot.lane.b32.xlu1 %v3905_v4, %s4124_s10  ;;  %3941 = vrot.lane.b32.xlu0 %v3900_v48, %s4122_s8 }
 0xaf2   :  { %v3907_v19 = vpop.permute.xlu1 %3906  ;;  %v3902_v51 = vpop.permute.xlu0 %3901 }
 0xaf3   :  { %v3903_v62 = vunpack.i.l.bf16 %v3902_v51  ;;  %v3908_v21 = vunpack.i.l.bf16 %v3907_v19  ;;  %v3904_v26 = vunpack.i.h.bf16 %v3902_v51  ;;  %v3909_v32 = vunpack.i.h.bf16 %v3907_v19 }
 0xaf5   :  { %v1773_v8 = vsel %vm159_vm3, %v1702_v31, %v3903_v62  ;;  %v1774_v61 = vsel %vm126_vm2, %v3904_v26, %v3908_v21 }
 0xaf6   :  { %v3222_v63 = vpack.c.bf16 %v1773_v8, %v1699_v2  ;;  %v3917_v37 = vpop.permute.xlu1 %3916  ;;  %v3912_v29 = vpop.permute.xlu0 %3911 }
 0xaf7   :  { %v3913_v17 = vunpack.i.l.bf16 %v3912_v29  ;;  %v3918_v41 = vunpack.i.l.bf16 %v3917_v37  ;;  %v3914_v36 = vunpack.i.h.bf16 %v3912_v29  ;;  %v3919_v30 = vunpack.i.h.bf16 %v3917_v37 }
 0xaf8   :  { %3224 = vmatprep.subr.msk.bf16.mxu0 %vm4354_vm8, %v3222_v63 }
 0xaf9   :  { %3227 = vmatpush3.bf16.msk.msra.mxu0 %vm4354_vm8, %v3222_v63  ;;  %v1775_v40 = vsel %vm93_vm4, %v3909_v32, %v3913_v17  ;;  %v3232_v55 = vpack.c.bf16 %v3918_v41, %v3914_v36 }
 0xafa   :  { %v3927_v39 = vpop.permute.xlu1 %3926  ;;  %v3922_v15 = vpop.permute.xlu0 %3921  ;;  %v3228_v5 = vpack.c.bf16 %v1775_v40, %v1774_v61 }
 0xafb   :  { %v3928_v44 = vunpack.i.l.bf16 %v3927_v39  ;;  %v3924_v58 = vunpack.i.h.bf16 %v3922_v15  ;;  %v3923_v24 = vunpack.i.l.bf16 %v3922_v15  ;;  %v3929_v54 = vunpack.i.h.bf16 %v3927_v39 }
 0xafc   :  { %3229 = vmatprep.subr.bf16.mxu0 %v3228_v5 }
 0xafd   :  { %3231 = vmatpush3.bf16.msra.mxu0 %v3228_v5  ;;  %v1776_v11 = vsel %vm159_vm3, %v3919_v30, %v3923_v24  ;;  %v1777_v59 = vsel %vm126_vm2, %v3924_v58, %v3928_v44 }
 0xafe   :  { %v3932_v60 = vpop.permute.xlu1 %3931  ;;  %v3937_v23 = vpop.permute.xlu0 %3936  ;;  %3233 = vmatprep.subr.bf16.mxu0 %v3232_v55  ;;  %v3236_v34 = vpack.c.bf16 %v1777_v59, %v1776_v11 }
 0xaff   :  { %v3938_v1 = vunpack.i.l.bf16 %v3937_v23  ;;  %v3939_v33 = vunpack.i.h.bf16 %v3937_v23  ;;  %v3933_v2 = vunpack.i.l.bf16 %v3932_v60  ;;  %v3934_v38 = vunpack.i.h.bf16 %v3932_v60 }
 0xb01   :  { %v1778_v47 = vsel %vm93_vm4, %v3929_v54, %v3938_v1  ;;  %3235 = vmatpush3.bf16.msra.mxu0 %v3232_v55 }
 0xb02   :  { %v3947_v49 = vpop.permute.xlu1 %3946  ;;  %v3942_v25 = vpop.permute.xlu0 %3941  ;;  %3237 = vmatprep.subr.bf16.mxu0 %v3236_v34  ;;  %v3240_v46 = vpack.c.bf16 %v3939_v33, %v1778_v47 }
 0xb03   :  { %v3943_v56 = vunpack.i.l.bf16 %v3942_v25  ;;  %v3948_v6 = vunpack.i.l.bf16 %v3947_v49  ;;  %v3944_v50 = vunpack.i.h.bf16 %v3942_v25  ;;  %v3949_v57 = vunpack.i.h.bf16 %v3947_v49 }
 0xb05   :  { %3239 = vmatpush3.bf16.msra.mxu0 %v3236_v34  ;;  %v1779_v31 = vsel %vm159_vm3, %v3933_v2, %v3943_v56  ;;  %v1780_v20 = vsel %vm126_vm2, %v3944_v50, %v3948_v6 }
 0xb06   :  { %3241 = vmatprep.subr.bf16.mxu0 %v3240_v46  ;;  %v3244_v52 = vpack.c.bf16 %v1779_v31, %v3934_v38  ;;  %v3248_v10 = vpack.c.bf16 %v3949_v57, %v1780_v20 }
 0xb09   :  { %3243 = vmatpush3.bf16.msra.mxu0 %v3240_v46 }
 0xb0a   :  { %3245 = vmatprep.subr.bf16.mxu0 %v3244_v52 }
 0xb0d   :  { %3247 = vmatpush3.bf16.msra.mxu0 %v3244_v52 }
 0xb0e   :  { %3250 = vmatprep.subr.msk.bf16.mxu0 %vm4448_vm11, %v3248_v10 }
 0xb11   :  { %3253 = vmatpush3.bf16.msk.msra.mxu0 %vm4448_vm11, %v3248_v10 }
 0xb14   :  { %2863 = vmatmul.mubr.msk.f32.vlgmr.msra.gmra.mrb[12].mxu0 %vm605_vm10, %v4110_v42 }
 0xb15   :  { %2924 = vmatprep.mubr.msk.f32.mxu0 %vm605_vm10, %v4111_v3 }
 0xbe7   :  { %v2864_v4 = vpop.f32.mrb[12].mxu0 }
 0xbe8   :  { %v1855_v48 = vadd.f32 %v2864_v4, %v4460_v13  ;;  %v1849_v53 = vpop.f32.mrb[13].mxu0 }
 0xbe9   :  { %v1850_v22 = vadd.f32 %v1849_v53, %v4462_v16 }
 0xbea   :  { %v1859_v28 = vmax.f32 %v1855_v48, 0.0 }
 0xbeb   :  { %v1858_v18 = vmax.f32 %v1850_v22, 0.0 }
 0xbec   :  { %1864 = vrot.lane.b32.xlu1 %v1859_v28, %s4115_s27 }
 0xbed   :  { %1862 = vrot.lane.b32.xlu0 %v1858_v18, %s4115_s27 }
 0xc5e   :  { %v1865_v19 = vpop.permute.xlu1 %1864 }
 0xc5f   :  { %v1869_v51 = vsel %vm73_vm0, 0.0, %v1865_v19  ;;  %v1863_v62 = vpop.permute.xlu0 %1862 }
 0xc60   :  { %v1871_v21 = vsel %vm80_vm1, %v1869_v51, 0.0  ;;  %v1868_v26 = vsel %vm73_vm0, 0.0, %v1863_v62 }
 0xc61   :  { %v1875_v8 = vrot.slane %v1871_v21, 6  ;;  %v1884_v63 = vrot.slane %v1871_v21, 4  ;;  %v1870_v13 = vsel %vm80_vm1, %v1868_v26, 0.0  ;;  %v1893_v37 = vrot.slane %v1871_v21, 2 }
 0xc62   :  { %v1874_v16 = vrot.slane %v1870_v13, 6  ;;  %v1883_v29 = vrot.slane %v1870_v13, 4  ;;  %v1892_v32 = vrot.slane %v1870_v13, 2  ;;  %v3965_v39 = vpack.i.bf16 %v1871_v21, %v1870_v13 }
 0xc63   :  { %v3980_v5 = vpack.i.bf16 %v1870_v13, %v1871_v21 }
 0xc64   :  { %v1885_v17 = vsel %vm126_vm2, %v1883_v29, %v1884_v63  ;;  %v1876_v41 = vsel %vm159_vm3, %v1874_v16, %v1875_v8  ;;  %v1894_v40 = vsel %vm93_vm4, %v1892_v32, %v1893_v37 }
 0xc65   :  { %v3955_v36 = vpack.i.bf16 %v1885_v17, %v1883_v29  ;;  %v3950_v61 = vpack.i.bf16 %v1876_v41, %v1874_v16  ;;  %v3960_v15 = vpack.i.bf16 %v1894_v40, %v1892_v32  ;;  %v4112_v29 = vld [vmem:[%s5148_s2 + $0x18] sm:$0x3] }
 0xc67   :  { %3956 = vrot.lane.b32.xlu1 %v3955_v36, %s4119_s5  ;;  %3951 = vrot.lane.b32.xlu0 %v3950_v61, %s4123_s9 }
 0xc6b   :  { %3966 = vrot.lane.b32.xlu1 %v3965_v39, %s4117_s29  ;;  %3961 = vrot.lane.b32.xlu0 %v3960_v15, %s4121_s7 }
 0xc6f   :  { %3976 = vrot.lane.b32.xlu1 %v3955_v36, %s4118_s30  ;;  %3971 = vrot.lane.b32.xlu0 %v3950_v61, %s4120_s6 }
 0xc73   :  { %3981 = vrot.lane.b32.xlu1 %v3980_v5, %s4116_s28  ;;  %3986 = vrot.lane.b32.xlu0 %v3960_v15, %s4125_s11 }
 0xc77   :  { %3996 = vrot.lane.b32.xlu1 %v3955_v36, %s4124_s10  ;;  %3991 = vrot.lane.b32.xlu0 %v3950_v61, %s4122_s8 }
 0xcd9   :  { %v3957_v30 = vpop.permute.xlu1 %3956  ;;  %v3952_v44 = vpop.permute.xlu0 %3951 }
 0xcda   :  { %v3953_v58 = vunpack.i.l.bf16 %v3952_v44  ;;  %v3958_v24 = vunpack.i.l.bf16 %v3957_v30  ;;  %v3954_v55 = vunpack.i.h.bf16 %v3952_v44  ;;  %v3959_v54 = vunpack.i.h.bf16 %v3957_v30 }
 0xcdc   :  { %v1942_v11 = vsel %vm159_vm3, %v1871_v21, %v3953_v58  ;;  %v1943_v47 = vsel %vm126_vm2, %v3954_v55, %v3958_v24 }
 0xcdd   :  { %v3254_v59 = vpack.c.bf16 %v1942_v11, %v1868_v26  ;;  %v3967_v60 = vpop.permute.xlu1 %3966  ;;  %v3962_v23 = vpop.permute.xlu0 %3961 }
 0xcde   :  { %v3963_v1 = vunpack.i.l.bf16 %v3962_v23  ;;  %v3968_v33 = vunpack.i.l.bf16 %v3967_v60  ;;  %v3964_v34 = vunpack.i.h.bf16 %v3962_v23  ;;  %v3969_v46 = vunpack.i.h.bf16 %v3967_v60 }
 0xcdf   :  { %3256 = vmatprep.subr.msk.bf16.mxu1 %vm4354_vm8, %v3254_v59 }
 0xce0   :  { %3259 = vmatpush3.bf16.msk.msra.mxu1 %vm4354_vm8, %v3254_v59  ;;  %v1944_v49 = vsel %vm93_vm4, %v3959_v54, %v3963_v1  ;;  %v3264_v38 = vpack.c.bf16 %v3968_v33, %v3964_v34 }
 0xce1   :  { %v3977_v25 = vpop.permute.xlu1 %3976  ;;  %v3972_v2 = vpop.permute.xlu0 %3971  ;;  %v3260_v56 = vpack.c.bf16 %v1944_v49, %v1943_v47 }
 0xce2   :  { %v3978_v6 = vunpack.i.l.bf16 %v3977_v25  ;;  %v3974_v50 = vunpack.i.h.bf16 %v3972_v2  ;;  %v3973_v31 = vunpack.i.l.bf16 %v3972_v2  ;;  %v3979_v42 = vunpack.i.h.bf16 %v3977_v25 }
 0xce3   :  { %3261 = vmatprep.subr.bf16.mxu1 %v3260_v56 }
 0xce4   :  { %3263 = vmatpush3.bf16.msra.mxu1 %v3260_v56  ;;  %v1945_v57 = vsel %vm159_vm3, %v3969_v46, %v3973_v31  ;;  %v1946_v52 = vsel %vm126_vm2, %v3974_v50, %v3978_v6 }
 0xce5   :  { %v3982_v20 = vpop.permute.xlu1 %3981  ;;  %v3987_v10 = vpop.permute.xlu0 %3986  ;;  %3265 = vmatprep.subr.bf16.mxu1 %v3264_v38  ;;  %v3268_v48 = vpack.c.bf16 %v1946_v52, %v1945_v57 }
 0xce6   :  { %v3988_v3 = vunpack.i.l.bf16 %v3987_v10  ;;  %v3989_v4 = vunpack.i.h.bf16 %v3987_v10  ;;  %v3983_v18 = vunpack.i.l.bf16 %v3982_v20  ;;  %v3984_v8 = vunpack.i.h.bf16 %v3982_v20 }
 0xce8   :  { %v1947_v53 = vsel %vm93_vm4, %v3979_v42, %v3988_v3  ;;  %3267 = vmatpush3.bf16.msra.mxu1 %v3264_v38 }
 0xce9   :  { %v3997_v22 = vpop.permute.xlu1 %3996  ;;  %v3992_v28 = vpop.permute.xlu0 %3991  ;;  %3269 = vmatprep.subr.bf16.mxu1 %v3268_v48  ;;  %v3272_v51 = vpack.c.bf16 %v3989_v4, %v1947_v53 }
 0xcea   :  { %v3993_v19 = vunpack.i.l.bf16 %v3992_v28  ;;  %v3998_v62 = vunpack.i.l.bf16 %v3997_v22  ;;  %v3994_v21 = vunpack.i.h.bf16 %v3992_v28  ;;  %v3999_v63 = vunpack.i.h.bf16 %v3997_v22 }
 0xcec   :  { %3271 = vmatpush3.bf16.msra.mxu1 %v3268_v48  ;;  %v1948_v26 = vsel %vm159_vm3, %v3983_v18, %v3993_v19  ;;  %v1949_v37 = vsel %vm126_vm2, %v3994_v21, %v3998_v62 }
 0xced   :  { %3273 = vmatprep.subr.bf16.mxu1 %v3272_v51  ;;  %v3276_v13 = vpack.c.bf16 %v1948_v26, %v3984_v8  ;;  %v3280_v16 = vpack.c.bf16 %v3999_v63, %v1949_v37 }
 0xcf0   :  { %3275 = vmatpush3.bf16.msra.mxu1 %v3272_v51 }
 0xcf1   :  { %3277 = vmatprep.subr.bf16.mxu1 %v3276_v13 }
 0xcf4   :  { %3279 = vmatpush3.bf16.msra.mxu1 %v3276_v13 }
 0xcf5   :  { %3282 = vmatprep.subr.msk.bf16.mxu1 %vm4448_vm11, %v3280_v16 }
 0xcf8   :  { %3285 = vmatpush3.bf16.msk.msra.mxu1 %vm4448_vm11, %v3280_v16 }
 0xcfb   :  { %2894 = vmatmul.mubr.msk.f32.vlgmr.msra.gmra.mrb[12].mxu1 %vm605_vm10, %v4112_v29 }
 0xcfc   :  { %2955 = vmatprep.mubr.msk.f32.mxu1 %vm605_vm10, %v4772_v35 }
 0xdce   :  { %v2895_v32 = vpop.f32.mrb[12].mxu1 }
 0xdcf   :  { %v2024_v17 = vadd.f32 %v2895_v32, %v4515_v43  ;;  %v2018_v41 = vpop.f32.mrb[13].mxu1 }
 0xdd0   :  { %v2019_v36 = vadd.f32 %v2018_v41, %v4517_v45 }
 0xdd1   :  { %v2028_v61 = vmax.f32 %v2024_v17, 0.0 }
 0xdd2   :  { %v2027_v40 = vmax.f32 %v2019_v36, 0.0 }
 0xdd3   :  { %2033 = vrot.lane.b32.xlu1 %v2028_v61, %s4115_s27 }
 0xdd4   :  { %2031 = vrot.lane.b32.xlu0 %v2027_v40, %s4115_s27 }
 0xe45   :  { %v2034_v39 = vpop.permute.xlu1 %2033 }
 0xe46   :  { %v2038_v15 = vsel %vm73_vm0, 0.0, %v2034_v39  ;;  %v2032_v5 = vpop.permute.xlu0 %2031 }
 0xe47   :  { %v2040_v30 = vsel %vm80_vm1, %v2038_v15, 0.0  ;;  %v2037_v35 = vsel %vm73_vm0, 0.0, %v2032_v5 }
 0xe48   :  { %v2044_v44 = vrot.slane %v2040_v30, 6  ;;  %v2053_v58 = vrot.slane %v2040_v30, 4  ;;  %v2039_v43 = vsel %vm80_vm1, %v2037_v35, 0.0  ;;  %v2062_v24 = vrot.slane %v2040_v30, 2 }
 0xe49   :  { %v2043_v45 = vrot.slane %v2039_v43, 6  ;;  %v2052_v55 = vrot.slane %v2039_v43, 4  ;;  %v2061_v11 = vrot.slane %v2039_v43, 2  ;;  %v4015_v33 = vpack.i.bf16 %v2040_v30, %v2039_v43 }
 0xe4a   :  { %v4030_v47 = vpack.i.bf16 %v2039_v43, %v2040_v30  ;;  %v4113_v43 = vld [vmem:[%s5148_s2 + $0x28] sm:$0x3] }
 0xe4b   :  { %v2054_v59 = vsel %vm126_vm2, %v2052_v55, %v2053_v58  ;;  %v2045_v60 = vsel %vm159_vm3, %v2043_v45, %v2044_v44  ;;  %v2063_v1 = vsel %vm93_vm4, %v2061_v11, %v2062_v24 }
 0xe4c   :  { %v4005_v23 = vpack.i.bf16 %v2054_v59, %v2052_v55  ;;  %v4000_v54 = vpack.i.bf16 %v2045_v60, %v2043_v45  ;;  %v4010_v34 = vpack.i.bf16 %v2063_v1, %v2061_v11 }
 0xe4e   :  { %4006 = vrot.lane.b32.xlu1 %v4005_v23, %s4119_s5  ;;  %4001 = vrot.lane.b32.xlu0 %v4000_v54, %s4123_s9 }
 0xe52   :  { %4016 = vrot.lane.b32.xlu1 %v4015_v33, %s4117_s29  ;;  %4011 = vrot.lane.b32.xlu0 %v4010_v34, %s4121_s7 }
 0xe56   :  { %4026 = vrot.lane.b32.xlu1 %v4005_v23, %s4118_s30  ;;  %4021 = vrot.lane.b32.xlu0 %v4000_v54, %s4120_s6 }
 0xe5a   :  { %4031 = vrot.lane.b32.xlu1 %v4030_v47, %s4116_s28  ;;  %4036 = vrot.lane.b32.xlu0 %v4010_v34, %s4125_s11 }
 0xe5e   :  { %4046 = vrot.lane.b32.xlu1 %v4005_v23, %s4124_s10  ;;  %4041 = vrot.lane.b32.xlu0 %v4000_v54, %s4122_s8 }
 0xec0   :  { %v4007_v49 = vpop.permute.xlu1 %4006  ;;  %v4002_v25 = vpop.permute.xlu0 %4001 }
 0xec1   :  { %v4003_v2 = vunpack.i.l.bf16 %v4002_v25  ;;  %v4008_v56 = vunpack.i.l.bf16 %v4007_v49  ;;  %v4004_v46 = vunpack.i.h.bf16 %v4002_v25  ;;  %v4009_v57 = vunpack.i.h.bf16 %v4007_v49 }
 0xec3   :  { %v2111_v6 = vsel %vm159_vm3, %v2040_v30, %v4003_v2  ;;  %v2112_v42 = vsel %vm126_vm2, %v4004_v46, %v4008_v56 }
 0xec4   :  { %v3286_v50 = vpack.c.bf16 %v2111_v6, %v2037_v35  ;;  %v4017_v31 = vpop.permute.xlu1 %4016  ;;  %v4012_v38 = vpop.permute.xlu0 %4011 }
 0xec5   :  { %v4013_v52 = vunpack.i.l.bf16 %v4012_v38  ;;  %v4018_v20 = vunpack.i.l.bf16 %v4017_v31  ;;  %v4014_v10 = vunpack.i.h.bf16 %v4012_v38  ;;  %v4019_v22 = vunpack.i.h.bf16 %v4017_v31 }
 0xec6   :  { %3288 = vmatprep.subr.msk.bf16.mxu0 %vm4354_vm8, %v3286_v50 }
 0xec7   :  { %3291 = vmatpush3.bf16.msk.msra.mxu0 %vm4354_vm8, %v3286_v50  ;;  %v2113_v3 = vsel %vm93_vm4, %v4009_v57, %v4013_v52  ;;  %v3296_v51 = vpack.c.bf16 %v4018_v20, %v4014_v10  ;;  %v42_v10 = vld [vmem:[%s5147_s3 + $0x48] sm:$0x3] }
 0xec8   :  { %v4027_v4 = vpop.permute.xlu1 %4026  ;;  %v4022_v48 = vpop.permute.xlu0 %4021  ;;  %v3292_v53 = vpack.c.bf16 %v2113_v3, %v2112_v42  ;;  %v41_v42 = vld [vmem:[%s5147_s3 + $0x40] sm:$0xff] }
 0xec9   :  { %v4028_v28 = vunpack.i.l.bf16 %v4027_v4  ;;  %v4024_v18 = vunpack.i.h.bf16 %v4022_v48  ;;  %v4023_v19 = vunpack.i.l.bf16 %v4022_v48  ;;  %v4029_v63 = vunpack.i.h.bf16 %v4027_v4 }
 0xeca   :  { %3293 = vmatprep.subr.bf16.mxu0 %v3292_v53 }
 0xecb   :  { %3295 = vmatpush3.bf16.msra.mxu0 %v3292_v53  ;;  %v2114_v62 = vsel %vm159_vm3, %v4019_v22, %v4023_v19  ;;  %v2115_v21 = vsel %vm126_vm2, %v4024_v18, %v4028_v28 }
 0xecc   :  { %v4032_v26 = vpop.permute.xlu1 %4031  ;;  %v4037_v8 = vpop.permute.xlu0 %4036  ;;  %3297 = vmatprep.subr.bf16.mxu0 %v3296_v51  ;;  %v3300_v16 = vpack.c.bf16 %v2115_v21, %v2114_v62 }
 0xecd   :  { %v4038_v13 = vunpack.i.l.bf16 %v4037_v8  ;;  %v4039_v37 = vunpack.i.h.bf16 %v4037_v8  ;;  %v4033_v41 = vunpack.i.l.bf16 %v4032_v26  ;;  %v4034_v5 = vunpack.i.h.bf16 %v4032_v26 }
 0xecf   :  { %v2116_v29 = vsel %vm93_vm4, %v4029_v63, %v4038_v13  ;;  %3299 = vmatpush3.bf16.msra.mxu0 %v3296_v51 }
 0xed0   :  { %v4047_v32 = vpop.permute.xlu1 %4046  ;;  %v4042_v17 = vpop.permute.xlu0 %4041  ;;  %3301 = vmatprep.subr.bf16.mxu0 %v3300_v16  ;;  %v3304_v61 = vpack.c.bf16 %v4039_v37, %v2116_v29 }
 0xed1   :  { %v4043_v36 = vunpack.i.l.bf16 %v4042_v17  ;;  %v4048_v40 = vunpack.i.l.bf16 %v4047_v32  ;;  %v4044_v39 = vunpack.i.h.bf16 %v4042_v17  ;;  %v4049_v30 = vunpack.i.h.bf16 %v4047_v32 }
 0xed3   :  { %3303 = vmatpush3.bf16.msra.mxu0 %v3300_v16  ;;  %v2117_v15 = vsel %vm159_vm3, %v4033_v41, %v4043_v36  ;;  %v2118_v44 = vsel %vm126_vm2, %v4044_v39, %v4048_v40 }
 0xed4   :  { %3305 = vmatprep.subr.bf16.mxu0 %v3304_v61  ;;  %v3308_v35 = vpack.c.bf16 %v2117_v15, %v4034_v5  ;;  %v3312_v58 = vpack.c.bf16 %v4049_v30, %v2118_v44 }
 0xed7   :  { %3307 = vmatpush3.bf16.msra.mxu0 %v3304_v61 }
 0xed8   :  { %3309 = vmatprep.subr.bf16.mxu0 %v3308_v35 }
 0xedb   :  { %3311 = vmatpush3.bf16.msra.mxu0 %v3308_v35 }
 0xedc   :  { %3314 = vmatprep.subr.msk.bf16.mxu0 %vm4448_vm11, %v3312_v58 }
 0xedf   :  { %3317 = vmatpush3.bf16.msk.msra.mxu0 %vm4448_vm11, %v3312_v58 }
 0xee2   :  { %2925 = vmatmul.mubr.msk.f32.vlgmr.msra.gmra.mrb[14].mxu0 %vm605_vm10, %v4113_v43 }
 0xfb5   :  { %v2926_v24 = vpop.f32.mrb[14].mxu0 }
 0xfb6   :  { %v2193_v45 = vadd.f32 %v2926_v24, %v4587_v7  ;;  %v2187_v55 = vpop.f32.mrb[15].mxu0 }
 0xfb7   :  { %v2188_v11 = vadd.f32 %v2187_v55, %v4592_v14 }
 0xfb8   :  { %v2197_v59 = vmax.f32 %v2193_v45, 0.0 }
 0xfb9   :  { %v2196_v60 = vmax.f32 %v2188_v11, 0.0 }
 0xfba   :  { %2202 = vrot.lane.b32.xlu1 %v2197_v59, %s4115_s27 }
 0xfbb   :  { %2200 = vrot.lane.b32.xlu0 %v2196_v60, %s4115_s27 }
0x102c   :  { %v2203_v23 = vpop.permute.xlu1 %2202 }
0x102d   :  { %v2207_v54 = vsel %vm73_vm0, 0.0, %v2203_v23  ;;  %v2201_v1 = vpop.permute.xlu0 %2200 }
0x102e   :  { %v2209_v33 = vsel %vm80_vm1, %v2207_v54, 0.0  ;;  %v2206_v34 = vsel %vm73_vm0, 0.0, %v2201_v1 }
0x102f   :  { %v2213_v47 = vrot.slane %v2209_v33, 6  ;;  %v2222_v49 = vrot.slane %v2209_v33, 4  ;;  %v2208_v7 = vsel %vm80_vm1, %v2206_v34, 0.0  ;;  %v2231_v25 = vrot.slane %v2209_v33, 2 }
0x1030   :  { %v2212_v14 = vrot.slane %v2208_v7, 6  ;;  %v2221_v2 = vrot.slane %v2208_v7, 4  ;;  %v2230_v56 = vrot.slane %v2208_v7, 2  ;;  %v4065_v57 = vpack.i.bf16 %v2209_v33, %v2208_v7 }
0x1031   :  { %v4080_v20 = vpack.i.bf16 %v2208_v7, %v2209_v33 }
0x1032   :  { %v2223_v46 = vsel %vm126_vm2, %v2221_v2, %v2222_v49  ;;  %v2214_v6 = vsel %vm159_vm3, %v2212_v14, %v2213_v47  ;;  %v2232_v38 = vsel %vm93_vm4, %v2230_v56, %v2231_v25 }
0x1033   :  { %v4055_v50 = vpack.i.bf16 %v2223_v46, %v2221_v2  ;;  %v4050_v31 = vpack.i.bf16 %v2214_v6, %v2212_v14  ;;  %v4060_v52 = vpack.i.bf16 %v2232_v38, %v2230_v56  ;;  %v4114_v2 = vld [vmem:[%s5148_s2 + $0x38] sm:$0x3] }
0x1035   :  { %4056 = vrot.lane.b32.xlu1 %v4055_v50, %s4119_s5  ;;  %4051 = vrot.lane.b32.xlu0 %v4050_v31, %s4123_s9 }
0x1039   :  { %4066 = vrot.lane.b32.xlu1 %v4065_v57, %s4117_s29  ;;  %4061 = vrot.lane.b32.xlu0 %v4060_v52, %s4121_s7 }
0x103d   :  { %4076 = vrot.lane.b32.xlu1 %v4055_v50, %s4118_s30  ;;  %4071 = vrot.lane.b32.xlu0 %v4050_v31, %s4120_s6 }
0x1041   :  { %4081 = vrot.lane.b32.xlu1 %v4080_v20, %s4116_s28  ;;  %4086 = vrot.lane.b32.xlu0 %v4060_v52, %s4125_s11 }
0x1045   :  { %4096 = vrot.lane.b32.xlu1 %v4055_v50, %s4124_s10  ;;  %4091 = vrot.lane.b32.xlu0 %v4050_v31, %s4122_s8 }
0x1049   :  { %1158 = vperm.xlu1 %3528, %v42_v10   ;;  %1153 = vperm.xlu0 %3529, %v41_v42  }
0x10a7   :  { %v4057_v3 = vpop.permute.xlu1 %4056  ;;  %v4052_v4 = vpop.permute.xlu0 %4051 }
0x10a8   :  { %v4053_v48 = vunpack.i.l.bf16 %v4052_v4  ;;  %v4058_v53 = vunpack.i.l.bf16 %v4057_v3  ;;  %v4054_v22 = vunpack.i.h.bf16 %v4052_v4  ;;  %v4059_v62 = vunpack.i.h.bf16 %v4057_v3 }
0x10aa   :  { %v2280_v28 = vsel %vm159_vm3, %v2209_v33, %v4053_v48  ;;  %v2281_v63 = vsel %vm126_vm2, %v4054_v22, %v4058_v53 }
0x10ab   :  { %v3318_v18 = vpack.c.bf16 %v2280_v28, %v2206_v34  ;;  %v4067_v19 = vpop.permute.xlu1 %4066  ;;  %v4062_v51 = vpop.permute.xlu0 %4061 }
0x10ac   :  { %v4063_v21 = vunpack.i.l.bf16 %v4062_v51  ;;  %v4068_v26 = vunpack.i.l.bf16 %v4067_v19  ;;  %v4064_v8 = vunpack.i.h.bf16 %v4062_v51  ;;  %v4069_v32 = vunpack.i.h.bf16 %v4067_v19 }
0x10ad   :  { %3320 = vmatprep.subr.msk.bf16.mxu1 %vm4354_vm8, %v3318_v18 }
0x10ae   :  { %3323 = vmatpush3.bf16.msk.msra.mxu1 %vm4354_vm8, %v3318_v18  ;;  %v2282_v13 = vsel %vm93_vm4, %v4059_v62, %v4063_v21  ;;  %v3328_v61 = vpack.c.bf16 %v4068_v26, %v4064_v8 }
0x10af   :  { %v4077_v37 = vpop.permute.xlu1 %4076  ;;  %v4072_v16 = vpop.permute.xlu0 %4071  ;;  %v3324_v29 = vpack.c.bf16 %v2282_v13, %v2281_v63 }
0x10b0   :  { %v4078_v17 = vunpack.i.l.bf16 %v4077_v37  ;;  %v4074_v41 = vunpack.i.h.bf16 %v4072_v16  ;;  %v4073_v36 = vunpack.i.l.bf16 %v4072_v16  ;;  %v4079_v5 = vunpack.i.h.bf16 %v4077_v37 }
0x10b1   :  { %3325 = vmatprep.subr.bf16.mxu1 %v3324_v29 }
0x10b2   :  { %3327 = vmatpush3.bf16.msra.mxu1 %v3324_v29  ;;  %v2283_v40 = vsel %vm159_vm3, %v4069_v32, %v4073_v36  ;;  %v2284_v39 = vsel %vm126_vm2, %v4074_v41, %v4078_v17 }
0x10b3   :  { %v4082_v27 = vpop.permute.xlu1 %4081  ;;  %v4087_v15 = vpop.permute.xlu0 %4086  ;;  %3329 = vmatprep.subr.bf16.mxu1 %v3328_v61  ;;  %v3332_v44 = vpack.c.bf16 %v2284_v39, %v2283_v40 }
0x10b4   :  { %v4088_v30 = vunpack.i.l.bf16 %v4087_v15  ;;  %v4089_v35 = vunpack.i.h.bf16 %v4087_v15  ;;  %v4083_v45 = vunpack.i.l.bf16 %v4082_v27  ;;  %v4084_v54 = vunpack.i.h.bf16 %v4082_v27 }
0x10b6   :  { %v2285_v58 = vsel %vm93_vm4, %v4079_v5, %v4088_v30  ;;  %3331 = vmatpush3.bf16.msra.mxu1 %v3328_v61 }
0x10b7   :  { %v4097_v43 = vpop.permute.xlu1 %4096  ;;  %v4092_v24 = vpop.permute.xlu0 %4091  ;;  %3333 = vmatprep.subr.bf16.mxu1 %v3332_v44  ;;  %v3336_v11 = vpack.c.bf16 %v4089_v35, %v2285_v58 }
0x10b8   :  { %v4093_v55 = vunpack.i.l.bf16 %v4092_v24  ;;  %v4098_v59 = vunpack.i.l.bf16 %v4097_v43  ;;  %v4094_v60 = vunpack.i.h.bf16 %v4092_v24  ;;  %v4099_v1 = vunpack.i.h.bf16 %v4097_v43 }
0x10ba   :  { %3335 = vmatpush3.bf16.msra.mxu1 %v3332_v44  ;;  %v2286_v23 = vsel %vm159_vm3, %v4083_v45, %v4093_v55  ;;  %v2287_v34 = vsel %vm126_vm2, %v4094_v60, %v4098_v59 }
0x10bb   :  { %3337 = vmatprep.subr.bf16.mxu1 %v3336_v11  ;;  %v3340_v33 = vpack.c.bf16 %v2286_v23, %v4084_v54  ;;  %v3344_v47 = vpack.c.bf16 %v4099_v1, %v2287_v34 }
0x10be   :  { %3339 = vmatpush3.bf16.msra.mxu1 %v3336_v11 }
0x10bf   :  { %3341 = vmatprep.subr.bf16.mxu1 %v3340_v33 }
0x10c2   :  { %3343 = vmatpush3.bf16.msra.mxu1 %v3340_v33 }
0x10c3   :  { %3346 = vmatprep.subr.msk.bf16.mxu1 %vm4448_vm11, %v3344_v47 }
0x10c6   :  { %3349 = vmatpush3.bf16.msk.msra.mxu1 %vm4448_vm11, %v3344_v47 }
0x10c8   :  { %v1159_v49 = vpop.permute.xlu1 %1158  ;;  %v1154_v7 = vpop.permute.xlu0 %1153 }
0x10c9   :  { %v1241_v25 = vadd.f32 %v4951_v0, %v1159_v49  ;;  %v1236_v14 = vadd.f32 %v4953_v9, %v1154_v7  ;;  %2956 = vmatmul.mubr.msk.f32.vlgmr.msra.gmra.mrb[14].mxu1 %vm605_vm10, %v4114_v2 }
0x10cb   :  { %v1245_v56 = vmax.f32 %v1241_v25, 0.0  ;;  %v1244_v46 = vmax.f32 %v1236_v14, 0.0 }
0x10cd   :  { %1249 = vst.msk [vmem:[%s5149_s4 + $0x8] sm:$0x1] %vm1248_vm12, %v1245_v56 }
0x10ce   :  { %1247 = vst.msk [vmem:[%s5149_s4] sm:$0xff] %vm1246_vm13, %v1244_v46 }
0x119c   :  { %v2957_v12 = vpop.f32.mrb[14].mxu1 }
0x119d   :  { %v2362_v0 = vadd.f32 %v2957_v12, %v1159_v49  ;;  %v2356_v9 = vpop.f32.mrb[15].mxu1 }
0x119e   :  { %v2357_v6 = vadd.f32 %v2356_v9, %v1154_v7 }
0x119f   :  { %v2366_v50 = vmax.f32 %v2362_v0, 0.0 }
0x11a0   :  { %v2365_v31 = vmax.f32 %v2357_v6, 0.0 }
0x11a1   :  { %2429 = vst.msk [vmem:[%s5149_s4 + $0x18] sm:$0x1] %vm1248_vm12, %v2366_v50 }
0x11a2   :  { %2428 = vst.msk [vmem:[%s5149_s4 + $0x10] sm:$0xff] %vm1246_vm13, %v2365_v31 }

</bundles_post_ra>
